<compile_context>
chip_gen: v7x
topology: tpu7x:2x2x1
jax: 0.10.0
libtpu: 0.0.40
codegen_flags: <defaults>
</compile_context>

<pallas_src>
import functools
import math

import jax
import jax.numpy as jnp
from jax.experimental import pallas as pl
from jax.experimental.pallas import tpu as pltpu

# ----- small synthetic BERT config -----
VOCAB = 64
TYPE_VOCAB = 2
MAX_POS = 16
HIDDEN = 32
NUM_HEADS = 2
HEAD_DIM = HIDDEN // NUM_HEADS
INTERMEDIATE = 64
NUM_LAYERS = 2
OUTPUT_SIZE = 4
OUT_PAD = 128            # lane-dense padded width for the regression-head output
LN_EPS = 1e-12


def _gelu(x):
    # TODO(synk): HF BERT default is exact erf-GELU; tanh approximation used here.
    return 0.5 * x * (1.0 + jnp.tanh(0.7978845608028654 * (x + 0.044715 * x * x * x)))


# ---------------- the single fused kernel ----------------

def _bert_kernel(ids_ref, pos_ids_ref, bias_ref,
                 word_emb_ref, pos_emb_ref, type_emb_ref, emb_g_ref, emb_b_ref,
                 wqkv_ref, bqkv_ref, wo_ref, bo_ref, ln1_g_ref, ln1_b_ref,
                 wi_ref, bi_ref, wo2_ref, bo2_ref, ln2_g_ref, ln2_b_ref,
                 head_w_ref, head_b_ref, out_ref, *, batch, seq):
    m_rows = batch * seq
    scale = 1.0 / math.sqrt(HEAD_DIM)

    def layer_norm(x, g, b):
        mu = jnp.mean(x, axis=-1, keepdims=True)
        var = jnp.mean(jnp.square(x - mu), axis=-1, keepdims=True)
        return (x - mu) * jax.lax.rsqrt(var + LN_EPS) * g + b

    # ---- embeddings fully in-kernel: one-hot gathers on the MXU, fused with LN ----
    tok_oh = (jax.lax.broadcasted_iota(jnp.int32, (m_rows, VOCAB), 1)
              == ids_ref[...]).astype(jnp.float32)                       # [M, V]
    tok = jnp.dot(tok_oh, word_emb_ref[...], preferred_element_type=jnp.float32)

    pos_oh = (jax.lax.broadcasted_iota(jnp.int32, (m_rows, MAX_POS), 1)
              == pos_ids_ref[...]).astype(jnp.float32)                   # [M, P]
    pos = jnp.dot(pos_oh, pos_emb_ref[...], preferred_element_type=jnp.float32)

    typ = type_emb_ref[0:1, :]                                           # token_type_ids == 0

    h = layer_norm(tok + pos + typ, emb_g_ref[...], emb_b_ref[...])      # [M, H]

    bias = bias_ref[...]                                                 # [M, M] additive mask

    for l in range(NUM_LAYERS):                                          # unrolled (L=2)
        # fused QKV projection: one MXU pass, lane-dense [M, 3H] output
        qkv = (jnp.dot(h, wqkv_ref[l], preferred_element_type=jnp.float32)
               + bqkv_ref[l])                                            # [M, 3H]
        wo_l = wo_ref[l]                                                 # [H, H]

        # attention as 2-D block-diagonal matmuls; heads unrolled; output projection
        # folded per-head (concat(ctx_h) @ Wo == sum_h ctx_h @ Wo[rows of head h])
        attn = None
        for hd in range(NUM_HEADS):
            lo = hd * HEAD_DIM
            q = qkv[:, lo:lo + HEAD_DIM]                                 # [M, dH]
            k = qkv[:, HIDDEN + lo:HIDDEN + lo + HEAD_DIM]               # [M, dH]
            v = qkv[:, 2 * HIDDEN + lo:2 * HIDDEN + lo + HEAD_DIM]       # [M, dH]

            s = jax.lax.dot_general(q, k, (((1,), (1,)), ((), ())),
                                    preferred_element_type=jnp.float32) * scale + bias
            m = jnp.max(s, axis=-1, keepdims=True)
            p = jnp.exp(s - m)
            p = p * pl.reciprocal(jnp.sum(p, axis=-1, keepdims=True), approx=True)
            ctx = jnp.dot(p, v, preferred_element_type=jnp.float32)      # [M, dH]

            part = jnp.dot(ctx, wo_l[lo:lo + HEAD_DIM, :],
                           preferred_element_type=jnp.float32)           # [M, H]
            attn = part if attn is None else attn + part

        h = layer_norm(attn + bo_ref[l] + h, ln1_g_ref[l], ln1_b_ref[l])

        # FFN: matmul + bias + GELU + matmul + bias + residual + LN, all fused
        ff = _gelu(jnp.dot(h, wi_ref[l], preferred_element_type=jnp.float32) + bi_ref[l])
        ff_out = jnp.dot(ff, wo2_ref[l], preferred_element_type=jnp.float32) + bo2_ref[l]
        h = layer_norm(ff_out + h, ln2_g_ref[l], ln2_b_ref[l])

    # regression head on ALL rows -> lane-dense (M, 128) store; wrapper picks CLS rows.
    out_ref[...] = (jnp.dot(h, head_w_ref[...], preferred_element_type=jnp.float32)
                    + head_b_ref[...]).astype(out_ref.dtype)


def _full_spec(shape):
    nd = len(shape)
    return pl.BlockSpec(shape, lambda i, _nd=nd: (0,) * _nd)


# ---------------- forward pass (one pallas_call) ----------------

def bert_regression_forward(params, input_ids, attention_mask):
    B, S = input_ids.shape
    M = B * S

    ids = input_ids.reshape(M, 1).astype(jnp.int32)
    # position ids per flattened row (constant-folded under jit)
    pos_ids = jnp.tile(jnp.arange(S, dtype=jnp.int32), B).reshape(M, 1)

    # [M, M] additive attention bias: batch block-diagonal + key-padding folded together.
    batch_ids = jnp.repeat(jnp.arange(B, dtype=jnp.int32), S)            # [M]
    key_ok = attention_mask.reshape(M).astype(jnp.int32) > 0             # [M]
    valid = (batch_ids[:, None] == batch_ids[None, :]) & key_ok[None, :]
    att_bias = jnp.where(valid, 0.0, -10000.0).astype(jnp.float32)       # [M, M]

    # lane-dense (128-wide) padded regression-head weights
    head_w = jnp.zeros((HIDDEN, OUT_PAD), jnp.float32).at[:, :OUTPUT_SIZE].set(params["head_w"])
    head_b = jnp.zeros((1, OUT_PAD), jnp.float32).at[:, :OUTPUT_SIZE].set(params["head_b"])

    inputs = (
        ids, pos_ids, att_bias,
        params["word_emb"], params["pos_emb"], params["type_emb"],
        params["emb_ln_g"].reshape(1, HIDDEN), params["emb_ln_b"].reshape(1, HIDDEN),
        params["wqkv"], params["bqkv"].reshape(NUM_LAYERS, 1, 3 * HIDDEN),
        params["wo"], params["bo"].reshape(NUM_LAYERS, 1, HIDDEN),
        params["ln1_g"].reshape(NUM_LAYERS, 1, HIDDEN),
        params["ln1_b"].reshape(NUM_LAYERS, 1, HIDDEN),
        params["wi"], params["bi"].reshape(NUM_LAYERS, 1, INTERMEDIATE),
        params["wo2"], params["bo2"].reshape(NUM_LAYERS, 1, HIDDEN),
        params["ln2_g"].reshape(NUM_LAYERS, 1, HIDDEN),
        params["ln2_b"].reshape(NUM_LAYERS, 1, HIDDEN),
        head_w, head_b,
    )

    out = pl.pallas_call(
        functools.partial(_bert_kernel, batch=B, seq=S),
        out_shape=jax.ShapeDtypeStruct((M, OUT_PAD), jnp.float32),
        grid=(1,),
        in_specs=[_full_spec(x.shape) for x in inputs],
        out_specs=_full_spec((M, OUT_PAD)),
        compiler_params=pltpu.CompilerParams(dimension_semantics=("arbitrary",)),
    )(*inputs)

    # CLS rows (0, S, 2S, ...) and the real OUTPUT_SIZE lanes of the padded slab.
    return out[0::S, :OUTPUT_SIZE]


# ---------------- parameter init (deterministic, synthetic, layer-stacked) ----------------

def init_params(key):
    def norm(k, shape):
        return jax.random.normal(k, shape, jnp.float32) * 0.02

    keys = iter(jax.random.split(key, 64))
    p = {
        "word_emb": norm(next(keys), (VOCAB, HIDDEN)),
        "pos_emb": norm(next(keys), (MAX_POS, HIDDEN)),
        "type_emb": norm(next(keys), (TYPE_VOCAB, HIDDEN)),
        "emb_ln_g": jnp.ones((HIDDEN,), jnp.float32),
        "emb_ln_b": jnp.zeros((HIDDEN,), jnp.float32),
    }
    layers = []
    for _ in range(NUM_LAYERS):
        wq = norm(next(keys), (HIDDEN, HIDDEN))
        wk = norm(next(keys), (HIDDEN, HIDDEN))
        wv = norm(next(keys), (HIDDEN, HIDDEN))
        layers.append(dict(
            wqkv=jnp.concatenate([wq, wk, wv], axis=1),     # fused QKV weight [H, 3H]
            bqkv=jnp.zeros((3 * HIDDEN,), jnp.float32),
            wo=norm(next(keys), (HIDDEN, HIDDEN)),
            bo=jnp.zeros((HIDDEN,), jnp.float32),
            ln1_g=jnp.ones((HIDDEN,), jnp.float32),
            ln1_b=jnp.zeros((HIDDEN,), jnp.float32),
            wi=norm(next(keys), (HIDDEN, INTERMEDIATE)),
            bi=jnp.zeros((INTERMEDIATE,), jnp.float32),
            wo2=norm(next(keys), (INTERMEDIATE, HIDDEN)),
            bo2=jnp.zeros((HIDDEN,), jnp.float32),
            ln2_g=jnp.ones((HIDDEN,), jnp.float32),
            ln2_b=jnp.zeros((HIDDEN,), jnp.float32),
        ))
    for name in layers[0]:
        p[name] = jnp.stack([lyr[name] for lyr in layers])   # [L, ...]
    p["head_w"] = norm(next(keys), (HIDDEN, OUTPUT_SIZE))
    p["head_b"] = jnp.zeros((OUTPUT_SIZE,), jnp.float32)
    return p


# ---------------- pure-JAX reference (for correctness check) ----------------

def _reference_forward(params, input_ids, attention_mask):
    B, S = input_ids.shape
    tok = params["word_emb"][input_ids]
    pos = params["pos_emb"][jnp.arange(S)][None, :, :]
    typ = params["type_emb"][jnp.zeros((B, S), jnp.int32)]
    x = tok + pos + typ

    def ln(x, g, b):
        mu = x.mean(-1, keepdims=True)
        var = jnp.square(x - mu).mean(-1, keepdims=True)
        return (x - mu) / jnp.sqrt(var + LN_EPS) * g + b

    h = ln(x, params["emb_ln_g"], params["emb_ln_b"])
    bias = (1.0 - attention_mask.astype(jnp.float32))[:, None, None, :] * -10000.0
    for l in range(NUM_LAYERS):
        qkv = h @ params["wqkv"][l] + params["bqkv"][l]
        q, k, v = jnp.split(qkv, 3, axis=-1)
        heads = lambda t: t.reshape(B, S, NUM_HEADS, HEAD_DIM).transpose(0, 2, 1, 3)
        q, k, v = heads(q), heads(k), heads(v)
        s = q @ k.transpose(0, 1, 3, 2) / math.sqrt(HEAD_DIM) + bias
        p = jax.nn.softmax(s, axis=-1)
        ctx = (p @ v).transpose(0, 2, 1, 3).reshape(B, S, HIDDEN)
        attn_out = ctx @ params["wo"][l] + params["bo"][l]
        h = ln(attn_out + h, params["ln1_g"][l], params["ln1_b"][l])
        ff = _gelu(h @ params["wi"][l] + params["bi"][l])
        ff_out = ff @ params["wo2"][l] + params["bo2"][l]
        h = ln(ff_out + h, params["ln2_g"][l], params["ln2_b"][l])
    return h[:, 0, :] @ params["head_w"] + params["head_b"]


if __name__ == "__main__":
    B, S = 2, 8
    key = jax.random.PRNGKey(0)
    k_param, k_ids = jax.random.split(key)

    params = init_params(k_param)
    input_ids = jax.random.randint(k_ids, (B, S), 0, VOCAB, dtype=jnp.int32)
    attention_mask = jnp.ones((B, S), jnp.int32).at[1, 6:].set(0)  # pad last 2 tokens of example 1

    preds = jax.jit(bert_regression_forward)(params, input_ids, attention_mask)
    jax.block_until_ready(preds)

    ref = _reference_forward(params, input_ids, attention_mask)
    assert preds.shape == (B, OUTPUT_SIZE)
    assert bool(jnp.all(jnp.isfinite(preds)))
    assert bool(jnp.allclose(preds, ref, atol=1e-2, rtol=1e-2))
    print("KERNEL_OK")
</pallas_src>

<mosaic_0001>
module attributes {stable_mosaic.version = 11 : i64} {
  func.func @_bert_kernel(%arg0: i32, %arg1: memref<16x1xi32, #tpu.memory_space<vmem>>, %arg2: memref<16x1xi32, #tpu.memory_space<vmem>>, %arg3: memref<16x16xf32, #tpu.memory_space<vmem>>, %arg4: memref<64x32xf32, #tpu.memory_space<vmem>>, %arg5: memref<16x32xf32, #tpu.memory_space<vmem>>, %arg6: memref<2x32xf32, #tpu.memory_space<vmem>>, %arg7: memref<1x32xf32, #tpu.memory_space<vmem>>, %arg8: memref<1x32xf32, #tpu.memory_space<vmem>>, %arg9: memref<2x32x96xf32, #tpu.memory_space<vmem>>, %arg10: memref<2x1x96xf32, #tpu.memory_space<vmem>>, %arg11: memref<2x32x32xf32, #tpu.memory_space<vmem>>, %arg12: memref<2x1x32xf32, #tpu.memory_space<vmem>>, %arg13: memref<2x1x32xf32, #tpu.memory_space<vmem>>, %arg14: memref<2x1x32xf32, #tpu.memory_space<vmem>>, %arg15: memref<2x32x64xf32, #tpu.memory_space<vmem>>, %arg16: memref<2x1x64xf32, #tpu.memory_space<vmem>>, %arg17: memref<2x64x32xf32, #tpu.memory_space<vmem>>, %arg18: memref<2x1x32xf32, #tpu.memory_space<vmem>>, %arg19: memref<2x1x32xf32, #tpu.memory_space<vmem>>, %arg20: memref<2x1x32xf32, #tpu.memory_space<vmem>>, %arg21: memref<32x128xf32, #tpu.memory_space<vmem>>, %arg22: memref<1x128xf32, #tpu.memory_space<vmem>>, %arg23: memref<16x128xf32, #tpu.memory_space<vmem>>) attributes {dimension_semantics = [#tpu.dimension_semantics<arbitrary>], iteration_bounds = array<i64: 1>, scalar_prefetch = 0 : i64, scratch_operands = 0 : i64, tpu.core_type = #tpu.core_type<tc>, window_params = [{pipeline_mode = #tpu.pipeline_mode<synchronous>, transform_indices = @transform_0, window_bounds = array<i64: 16, 1>}, {pipeline_mode = #tpu.pipeline_mode<synchronous>, transform_indices = @transform_1, window_bounds = array<i64: 16, 1>}, {pipeline_mode = #tpu.pipeline_mode<synchronous>, transform_indices = @transform_2, window_bounds = array<i64: 16, 16>}, {pipeline_mode = #tpu.pipeline_mode<synchronous>, transform_indices = @transform_3, window_bounds = array<i64: 64, 32>}, {pipeline_mode = #tpu.pipeline_mode<synchronous>, transform_indices = @transform_4, window_bounds = array<i64: 16, 32>}, {pipeline_mode = #tpu.pipeline_mode<synchronous>, transform_indices = @transform_5, window_bounds = array<i64: 2, 32>}, {pipeline_mode = #tpu.pipeline_mode<synchronous>, transform_indices = @transform_6, window_bounds = array<i64: 1, 32>}, {pipeline_mode = #tpu.pipeline_mode<synchronous>, transform_indices = @transform_7, window_bounds = array<i64: 1, 32>}, {pipeline_mode = #tpu.pipeline_mode<synchronous>, transform_indices = @transform_8, window_bounds = array<i64: 2, 32, 96>}, {pipeline_mode = #tpu.pipeline_mode<synchronous>, transform_indices = @transform_9, window_bounds = array<i64: 2, 1, 96>}, {pipeline_mode = #tpu.pipeline_mode<synchronous>, transform_indices = @transform_10, window_bounds = array<i64: 2, 32, 32>}, {pipeline_mode = #tpu.pipeline_mode<synchronous>, transform_indices = @transform_11, window_bounds = array<i64: 2, 1, 32>}, {pipeline_mode = #tpu.pipeline_mode<synchronous>, transform_indices = @transform_12, window_bounds = array<i64: 2, 1, 32>}, {pipeline_mode = #tpu.pipeline_mode<synchronous>, transform_indices = @transform_13, window_bounds = array<i64: 2, 1, 32>}, {pipeline_mode = #tpu.pipeline_mode<synchronous>, transform_indices = @transform_14, window_bounds = array<i64: 2, 32, 64>}, {pipeline_mode = #tpu.pipeline_mode<synchronous>, transform_indices = @transform_15, window_bounds = array<i64: 2, 1, 64>}, {pipeline_mode = #tpu.pipeline_mode<synchronous>, transform_indices = @transform_16, window_bounds = array<i64: 2, 64, 32>}, {pipeline_mode = #tpu.pipeline_mode<synchronous>, transform_indices = @transform_17, window_bounds = array<i64: 2, 1, 32>}, {pipeline_mode = #tpu.pipeline_mode<synchronous>, transform_indices = @transform_18, window_bounds = array<i64: 2, 1, 32>}, {pipeline_mode = #tpu.pipeline_mode<synchronous>, transform_indices = @transform_19, window_bounds = array<i64: 2, 1, 32>}, {pipeline_mode = #tpu.pipeline_mode<synchronous>, transform_indices = @transform_20, window_bounds = array<i64: 32, 128>}, {pipeline_mode = #tpu.pipeline_mode<synchronous>, transform_indices = @transform_21, window_bounds = array<i64: 1, 128>}, {pipeline_mode = #tpu.pipeline_mode<synchronous>, transform_indices = @transform_22, window_bounds = array<i64: 16, 128>}]} {
    %0 = tpu.iota {dimensions = array<i32: 1>} : vector<16x64xi32>
    %c0 = arith.constant 0 : index
    %c0_0 = arith.constant 0 : index
    %1 = vector.load %arg1[%c0, %c0_0] : memref<16x1xi32, #tpu.memory_space<vmem>>, vector<16x1xi32>
    %2 = vector.broadcast %1 : vector<16x1xi32> to vector<16x64xi32>
    %3 = arith.cmpi eq, %0, %2 : vector<16x64xi32>
    %4 = arith.extui %3 : vector<16x64xi1> to vector<16x64xi32>
    %5 = arith.sitofp %4 : vector<16x64xi32> to vector<16x64xf32>
    %c0_1 = arith.constant 0 : index
    %c0_2 = arith.constant 0 : index
    %6 = vector.load %arg4[%c0_1, %c0_2] : memref<64x32xf32, #tpu.memory_space<vmem>>, vector<64x32xf32>
    %cst = arith.constant dense<0.000000e+00> : vector<16x32xf32>
    %7 = tpu.matmul %5, %6, %cst {dimension_numbers = #tpu.dot_dimension_numbers<[1], [0], [0], [1], [0, 0, 1, 1], [], []>} : vector<16x64xf32>, vector<64x32xf32>, vector<16x32xf32> -> vector<16x32xf32>
    %8 = tpu.iota {dimensions = array<i32: 1>} : vector<16x16xi32>
    %c0_3 = arith.constant 0 : index
    %c0_4 = arith.constant 0 : index
    %9 = vector.load %arg2[%c0_3, %c0_4] : memref<16x1xi32, #tpu.memory_space<vmem>>, vector<16x1xi32>
    %10 = vector.broadcast %9 : vector<16x1xi32> to vector<16x16xi32>
    %11 = arith.cmpi eq, %8, %10 : vector<16x16xi32>
    %12 = arith.extui %11 : vector<16x16xi1> to vector<16x16xi32>
    %13 = arith.sitofp %12 : vector<16x16xi32> to vector<16x16xf32>
    %c0_5 = arith.constant 0 : index
    %c0_6 = arith.constant 0 : index
    %14 = vector.load %arg5[%c0_5, %c0_6] : memref<16x32xf32, #tpu.memory_space<vmem>>, vector<16x32xf32>
    %cst_7 = arith.constant dense<0.000000e+00> : vector<16x32xf32>
    %15 = tpu.matmul %13, %14, %cst_7 {dimension_numbers = #tpu.dot_dimension_numbers<[1], [0], [0], [1], [0, 0, 1, 1], [], []>} : vector<16x16xf32>, vector<16x32xf32>, vector<16x32xf32> -> vector<16x32xf32>
    %c0_8 = arith.constant 0 : index
    %c0_9 = arith.constant 0 : index
    %16 = vector.load %arg6[%c0_8, %c0_9] : memref<2x32xf32, #tpu.memory_space<vmem>>, vector<1x32xf32>
    %17 = arith.addf %7, %15 : vector<16x32xf32>
    %18 = vector.broadcast %16 : vector<1x32xf32> to vector<16x32xf32>
    %19 = arith.addf %17, %18 : vector<16x32xf32>
    %c0_10 = arith.constant 0 : index
    %c0_11 = arith.constant 0 : index
    %20 = vector.load %arg7[%c0_10, %c0_11] : memref<1x32xf32, #tpu.memory_space<vmem>>, vector<1x32xf32>
    %c0_12 = arith.constant 0 : index
    %c0_13 = arith.constant 0 : index
    %21 = vector.load %arg8[%c0_12, %c0_13] : memref<1x32xf32, #tpu.memory_space<vmem>>, vector<1x32xf32>
    %cst_14 = arith.constant dense<0.000000e+00> : vector<16xf32>
    %22 = vector.multi_reduction <add>, %19, %cst_14 [1] : vector<16x32xf32> to vector<16xf32>
    %23 = vector.shape_cast %22 : vector<16xf32> to vector<16x1xf32>
    %cst_15 = arith.constant 3.200000e+01 : f32
    %24 = vector.broadcast %cst_15 : f32 to vector<16x1xf32>
    %25 = arith.divf %23, %24 : vector<16x1xf32>
    %26 = vector.broadcast %25 : vector<16x1xf32> to vector<16x32xf32>
    %27 = arith.subf %19, %26 : vector<16x32xf32>
    %28 = arith.mulf %27, %27 : vector<16x32xf32>
    %cst_16 = arith.constant dense<0.000000e+00> : vector<16xf32>
    %29 = vector.multi_reduction <add>, %28, %cst_16 [1] : vector<16x32xf32> to vector<16xf32>
    %30 = vector.shape_cast %29 : vector<16xf32> to vector<16x1xf32>
    %cst_17 = arith.constant 3.200000e+01 : f32
    %31 = vector.broadcast %cst_17 : f32 to vector<16x1xf32>
    %32 = arith.divf %30, %31 : vector<16x1xf32>
    %33 = vector.broadcast %25 : vector<16x1xf32> to vector<16x32xf32>
    %34 = arith.subf %19, %33 : vector<16x32xf32>
    %cst_18 = arith.constant 9.99999996E-13 : f32
    %35 = vector.broadcast %cst_18 : f32 to vector<16x1xf32>
    %36 = arith.addf %32, %35 : vector<16x1xf32>
    %37 = math.rsqrt %36 : vector<16x1xf32>
    %38 = vector.broadcast %37 : vector<16x1xf32> to vector<16x32xf32>
    %39 = arith.mulf %34, %38 : vector<16x32xf32>
    %40 = vector.broadcast %20 : vector<1x32xf32> to vector<16x32xf32>
    %41 = arith.mulf %39, %40 : vector<16x32xf32>
    %42 = vector.broadcast %21 : vector<1x32xf32> to vector<16x32xf32>
    %43 = arith.addf %41, %42 : vector<16x32xf32>
    %c0_19 = arith.constant 0 : index
    %c0_20 = arith.constant 0 : index
    %44 = vector.load %arg3[%c0_19, %c0_20] : memref<16x16xf32, #tpu.memory_space<vmem>>, vector<16x16xf32>
    %c0_21 = arith.constant 0 : index
    %c0_22 = arith.constant 0 : index
    %c0_23 = arith.constant 0 : index
    %45 = vector.load %arg9[%c0_21, %c0_22, %c0_23] : memref<2x32x96xf32, #tpu.memory_space<vmem>>, vector<1x32x96xf32>
    %46 = vector.shape_cast %45 : vector<1x32x96xf32> to vector<32x96xf32>
    %cst_24 = arith.constant dense<0.000000e+00> : vector<16x96xf32>
    %47 = tpu.matmul %43, %46, %cst_24 {dimension_numbers = #tpu.dot_dimension_numbers<[1], [0], [0], [1], [0, 0, 1, 1], [], []>} : vector<16x32xf32>, vector<32x96xf32>, vector<16x96xf32> -> vector<16x96xf32>
    %c0_25 = arith.constant 0 : index
    %c0_26 = arith.constant 0 : index
    %c0_27 = arith.constant 0 : index
    %48 = vector.load %arg10[%c0_25, %c0_26, %c0_27] : memref<2x1x96xf32, #tpu.memory_space<vmem>>, vector<1x1x96xf32>
    %49 = vector.shape_cast %48 : vector<1x1x96xf32> to vector<1x96xf32>
    %50 = vector.broadcast %49 : vector<1x96xf32> to vector<16x96xf32>
    %51 = arith.addf %47, %50 : vector<16x96xf32>
    %c0_28 = arith.constant 0 : index
    %c0_29 = arith.constant 0 : index
    %c0_30 = arith.constant 0 : index
    %52 = vector.load %arg11[%c0_28, %c0_29, %c0_30] : memref<2x32x32xf32, #tpu.memory_space<vmem>>, vector<1x32x32xf32>
    %53 = vector.shape_cast %52 : vector<1x32x32xf32> to vector<32x32xf32>
    %54 = vector.extract_strided_slice %51 {offsets = [0, 0], sizes = [16, 16], strides = [1, 1]} : vector<16x96xf32> to vector<16x16xf32>
    %55 = vector.extract_strided_slice %51 {offsets = [0, 32], sizes = [16, 16], strides = [1, 1]} : vector<16x96xf32> to vector<16x16xf32>
    %56 = vector.extract_strided_slice %51 {offsets = [0, 64], sizes = [16, 16], strides = [1, 1]} : vector<16x96xf32> to vector<16x16xf32>
    %cst_31 = arith.constant dense<0.000000e+00> : vector<16x16xf32>
    %57 = tpu.matmul %54, %55, %cst_31 {dimension_numbers = #tpu.dot_dimension_numbers<[1], [1], [0], [0], [0, 0, 1, 0], [], []>} : vector<16x16xf32>, vector<16x16xf32>, vector<16x16xf32> -> vector<16x16xf32>
    %cst_32 = arith.constant 2.500000e-01 : f32
    %58 = vector.broadcast %cst_32 : f32 to vector<16x16xf32>
    %59 = arith.mulf %57, %58 : vector<16x16xf32>
    %60 = arith.addf %59, %44 : vector<16x16xf32>
    %cst_33 = arith.constant dense<0xFF800000> : vector<16xf32>
    %61 = vector.multi_reduction <maximumf>, %60, %cst_33 [1] : vector<16x16xf32> to vector<16xf32>
    %62 = vector.shape_cast %61 : vector<16xf32> to vector<16x1xf32>
    %63 = vector.broadcast %62 : vector<16x1xf32> to vector<16x16xf32>
    %64 = arith.subf %60, %63 : vector<16x16xf32>
    %65 = math.exp %64 : vector<16x16xf32>
    %cst_34 = arith.constant dense<0.000000e+00> : vector<16xf32>
    %66 = vector.multi_reduction <add>, %65, %cst_34 [1] : vector<16x16xf32> to vector<16xf32>
    %67 = vector.shape_cast %66 : vector<16xf32> to vector<16x1xf32>
    %68 = tpu.reciprocal %67 {approx = true} : vector<16x1xf32> -> vector<16x1xf32>
    %69 = vector.broadcast %68 : vector<16x1xf32> to vector<16x16xf32>
    %70 = arith.mulf %65, %69 : vector<16x16xf32>
    %cst_35 = arith.constant dense<0.000000e+00> : vector<16x16xf32>
    %71 = tpu.matmul %70, %56, %cst_35 {dimension_numbers = #tpu.dot_dimension_numbers<[1], [0], [0], [1], [0, 0, 1, 1], [], []>} : vector<16x16xf32>, vector<16x16xf32>, vector<16x16xf32> -> vector<16x16xf32>
    %72 = vector.extract_strided_slice %53 {offsets = [0, 0], sizes = [16, 32], strides = [1, 1]} : vector<32x32xf32> to vector<16x32xf32>
    %cst_36 = arith.constant dense<0.000000e+00> : vector<16x32xf32>
    %73 = tpu.matmul %71, %72, %cst_36 {dimension_numbers = #tpu.dot_dimension_numbers<[1], [0], [0], [1], [0, 0, 1, 1], [], []>} : vector<16x16xf32>, vector<16x32xf32>, vector<16x32xf32> -> vector<16x32xf32>
    %74 = vector.extract_strided_slice %51 {offsets = [0, 16], sizes = [16, 16], strides = [1, 1]} : vector<16x96xf32> to vector<16x16xf32>
    %75 = vector.extract_strided_slice %51 {offsets = [0, 48], sizes = [16, 16], strides = [1, 1]} : vector<16x96xf32> to vector<16x16xf32>
    %76 = vector.extract_strided_slice %51 {offsets = [0, 80], sizes = [16, 16], strides = [1, 1]} : vector<16x96xf32> to vector<16x16xf32>
    %cst_37 = arith.constant dense<0.000000e+00> : vector<16x16xf32>
    %77 = tpu.matmul %74, %75, %cst_37 {dimension_numbers = #tpu.dot_dimension_numbers<[1], [1], [0], [0], [0, 0, 1, 0], [], []>} : vector<16x16xf32>, vector<16x16xf32>, vector<16x16xf32> -> vector<16x16xf32>
    %cst_38 = arith.constant 2.500000e-01 : f32
    %78 = vector.broadcast %cst_38 : f32 to vector<16x16xf32>
    %79 = arith.mulf %77, %78 : vector<16x16xf32>
    %80 = arith.addf %79, %44 : vector<16x16xf32>
    %cst_39 = arith.constant dense<0xFF800000> : vector<16xf32>
    %81 = vector.multi_reduction <maximumf>, %80, %cst_39 [1] : vector<16x16xf32> to vector<16xf32>
    %82 = vector.shape_cast %81 : vector<16xf32> to vector<16x1xf32>
    %83 = vector.broadcast %82 : vector<16x1xf32> to vector<16x16xf32>
    %84 = arith.subf %80, %83 : vector<16x16xf32>
    %85 = math.exp %84 : vector<16x16xf32>
    %cst_40 = arith.constant dense<0.000000e+00> : vector<16xf32>
    %86 = vector.multi_reduction <add>, %85, %cst_40 [1] : vector<16x16xf32> to vector<16xf32>
    %87 = vector.shape_cast %86 : vector<16xf32> to vector<16x1xf32>
    %88 = tpu.reciprocal %87 {approx = true} : vector<16x1xf32> -> vector<16x1xf32>
    %89 = vector.broadcast %88 : vector<16x1xf32> to vector<16x16xf32>
    %90 = arith.mulf %85, %89 : vector<16x16xf32>
    %cst_41 = arith.constant dense<0.000000e+00> : vector<16x16xf32>
    %91 = tpu.matmul %90, %76, %cst_41 {dimension_numbers = #tpu.dot_dimension_numbers<[1], [0], [0], [1], [0, 0, 1, 1], [], []>} : vector<16x16xf32>, vector<16x16xf32>, vector<16x16xf32> -> vector<16x16xf32>
    %92 = vector.extract_strided_slice %53 {offsets = [16, 0], sizes = [16, 32], strides = [1, 1]} : vector<32x32xf32> to vector<16x32xf32>
    %cst_42 = arith.constant dense<0.000000e+00> : vector<16x32xf32>
    %93 = tpu.matmul %91, %92, %cst_42 {dimension_numbers = #tpu.dot_dimension_numbers<[1], [0], [0], [1], [0, 0, 1, 1], [], []>} : vector<16x16xf32>, vector<16x32xf32>, vector<16x32xf32> -> vector<16x32xf32>
    %94 = arith.addf %73, %93 : vector<16x32xf32>
    %c0_43 = arith.constant 0 : index
    %c0_44 = arith.constant 0 : index
    %c0_45 = arith.constant 0 : index
    %95 = vector.load %arg12[%c0_43, %c0_44, %c0_45] : memref<2x1x32xf32, #tpu.memory_space<vmem>>, vector<1x1x32xf32>
    %96 = vector.shape_cast %95 : vector<1x1x32xf32> to vector<1x32xf32>
    %97 = vector.broadcast %96 : vector<1x32xf32> to vector<16x32xf32>
    %98 = arith.addf %94, %97 : vector<16x32xf32>
    %99 = arith.addf %98, %43 : vector<16x32xf32>
    %c0_46 = arith.constant 0 : index
    %c0_47 = arith.constant 0 : index
    %c0_48 = arith.constant 0 : index
    %100 = vector.load %arg13[%c0_46, %c0_47, %c0_48] : memref<2x1x32xf32, #tpu.memory_space<vmem>>, vector<1x1x32xf32>
    %101 = vector.shape_cast %100 : vector<1x1x32xf32> to vector<1x32xf32>
    %c0_49 = arith.constant 0 : index
    %c0_50 = arith.constant 0 : index
    %c0_51 = arith.constant 0 : index
    %102 = vector.load %arg14[%c0_49, %c0_50, %c0_51] : memref<2x1x32xf32, #tpu.memory_space<vmem>>, vector<1x1x32xf32>
    %103 = vector.shape_cast %102 : vector<1x1x32xf32> to vector<1x32xf32>
    %cst_52 = arith.constant dense<0.000000e+00> : vector<16xf32>
    %104 = vector.multi_reduction <add>, %99, %cst_52 [1] : vector<16x32xf32> to vector<16xf32>
    %105 = vector.shape_cast %104 : vector<16xf32> to vector<16x1xf32>
    %cst_53 = arith.constant 3.200000e+01 : f32
    %106 = vector.broadcast %cst_53 : f32 to vector<16x1xf32>
    %107 = arith.divf %105, %106 : vector<16x1xf32>
    %108 = vector.broadcast %107 : vector<16x1xf32> to vector<16x32xf32>
    %109 = arith.subf %99, %108 : vector<16x32xf32>
    %110 = arith.mulf %109, %109 : vector<16x32xf32>
    %cst_54 = arith.constant dense<0.000000e+00> : vector<16xf32>
    %111 = vector.multi_reduction <add>, %110, %cst_54 [1] : vector<16x32xf32> to vector<16xf32>
    %112 = vector.shape_cast %111 : vector<16xf32> to vector<16x1xf32>
    %cst_55 = arith.constant 3.200000e+01 : f32
    %113 = vector.broadcast %cst_55 : f32 to vector<16x1xf32>
    %114 = arith.divf %112, %113 : vector<16x1xf32>
    %115 = vector.broadcast %107 : vector<16x1xf32> to vector<16x32xf32>
    %116 = arith.subf %99, %115 : vector<16x32xf32>
    %cst_56 = arith.constant 9.99999996E-13 : f32
    %117 = vector.broadcast %cst_56 : f32 to vector<16x1xf32>
    %118 = arith.addf %114, %117 : vector<16x1xf32>
    %119 = math.rsqrt %118 : vector<16x1xf32>
    %120 = vector.broadcast %119 : vector<16x1xf32> to vector<16x32xf32>
    %121 = arith.mulf %116, %120 : vector<16x32xf32>
    %122 = vector.broadcast %101 : vector<1x32xf32> to vector<16x32xf32>
    %123 = arith.mulf %121, %122 : vector<16x32xf32>
    %124 = vector.broadcast %103 : vector<1x32xf32> to vector<16x32xf32>
    %125 = arith.addf %123, %124 : vector<16x32xf32>
    %c0_57 = arith.constant 0 : index
    %c0_58 = arith.constant 0 : index
    %c0_59 = arith.constant 0 : index
    %126 = vector.load %arg15[%c0_57, %c0_58, %c0_59] : memref<2x32x64xf32, #tpu.memory_space<vmem>>, vector<1x32x64xf32>
    %127 = vector.shape_cast %126 : vector<1x32x64xf32> to vector<32x64xf32>
    %cst_60 = arith.constant dense<0.000000e+00> : vector<16x64xf32>
    %128 = tpu.matmul %125, %127, %cst_60 {dimension_numbers = #tpu.dot_dimension_numbers<[1], [0], [0], [1], [0, 0, 1, 1], [], []>} : vector<16x32xf32>, vector<32x64xf32>, vector<16x64xf32> -> vector<16x64xf32>
    %c0_61 = arith.constant 0 : index
    %c0_62 = arith.constant 0 : index
    %c0_63 = arith.constant 0 : index
    %129 = vector.load %arg16[%c0_61, %c0_62, %c0_63] : memref<2x1x64xf32, #tpu.memory_space<vmem>>, vector<1x1x64xf32>
    %130 = vector.shape_cast %129 : vector<1x1x64xf32> to vector<1x64xf32>
    %131 = vector.broadcast %130 : vector<1x64xf32> to vector<16x64xf32>
    %132 = arith.addf %128, %131 : vector<16x64xf32>
    %cst_64 = arith.constant 5.000000e-01 : f32
    %133 = vector.broadcast %cst_64 : f32 to vector<16x64xf32>
    %134 = arith.mulf %133, %132 : vector<16x64xf32>
    %cst_65 = arith.constant 4.471500e-02 : f32
    %135 = vector.broadcast %cst_65 : f32 to vector<16x64xf32>
    %136 = arith.mulf %135, %132 : vector<16x64xf32>
    %137 = arith.mulf %136, %132 : vector<16x64xf32>
    %138 = arith.mulf %137, %132 : vector<16x64xf32>
    %139 = arith.addf %132, %138 : vector<16x64xf32>
    %cst_66 = arith.constant 0.797884583 : f32
    %140 = vector.broadcast %cst_66 : f32 to vector<16x64xf32>
    %141 = arith.mulf %140, %139 : vector<16x64xf32>
    %142 = math.tanh %141 : vector<16x64xf32>
    %cst_67 = arith.constant 1.000000e+00 : f32
    %143 = vector.broadcast %cst_67 : f32 to vector<16x64xf32>
    %144 = arith.addf %143, %142 : vector<16x64xf32>
    %145 = arith.mulf %134, %144 : vector<16x64xf32>
    %c0_68 = arith.constant 0 : index
    %c0_69 = arith.constant 0 : index
    %c0_70 = arith.constant 0 : index
    %146 = vector.load %arg17[%c0_68, %c0_69, %c0_70] : memref<2x64x32xf32, #tpu.memory_space<vmem>>, vector<1x64x32xf32>
    %147 = vector.shape_cast %146 : vector<1x64x32xf32> to vector<64x32xf32>
    %cst_71 = arith.constant dense<0.000000e+00> : vector<16x32xf32>
    %148 = tpu.matmul %145, %147, %cst_71 {dimension_numbers = #tpu.dot_dimension_numbers<[1], [0], [0], [1], [0, 0, 1, 1], [], []>} : vector<16x64xf32>, vector<64x32xf32>, vector<16x32xf32> -> vector<16x32xf32>
    %c0_72 = arith.constant 0 : index
    %c0_73 = arith.constant 0 : index
    %c0_74 = arith.constant 0 : index
    %149 = vector.load %arg18[%c0_72, %c0_73, %c0_74] : memref<2x1x32xf32, #tpu.memory_space<vmem>>, vector<1x1x32xf32>
    %150 = vector.shape_cast %149 : vector<1x1x32xf32> to vector<1x32xf32>
    %151 = vector.broadcast %150 : vector<1x32xf32> to vector<16x32xf32>
    %152 = arith.addf %148, %151 : vector<16x32xf32>
    %153 = arith.addf %152, %125 : vector<16x32xf32>
    %c0_75 = arith.constant 0 : index
    %c0_76 = arith.constant 0 : index
    %c0_77 = arith.constant 0 : index
    %154 = vector.load %arg19[%c0_75, %c0_76, %c0_77] : memref<2x1x32xf32, #tpu.memory_space<vmem>>, vector<1x1x32xf32>
    %155 = vector.shape_cast %154 : vector<1x1x32xf32> to vector<1x32xf32>
    %c0_78 = arith.constant 0 : index
    %c0_79 = arith.constant 0 : index
    %c0_80 = arith.constant 0 : index
    %156 = vector.load %arg20[%c0_78, %c0_79, %c0_80] : memref<2x1x32xf32, #tpu.memory_space<vmem>>, vector<1x1x32xf32>
    %157 = vector.shape_cast %156 : vector<1x1x32xf32> to vector<1x32xf32>
    %cst_81 = arith.constant dense<0.000000e+00> : vector<16xf32>
    %158 = vector.multi_reduction <add>, %153, %cst_81 [1] : vector<16x32xf32> to vector<16xf32>
    %159 = vector.shape_cast %158 : vector<16xf32> to vector<16x1xf32>
    %cst_82 = arith.constant 3.200000e+01 : f32
    %160 = vector.broadcast %cst_82 : f32 to vector<16x1xf32>
    %161 = arith.divf %159, %160 : vector<16x1xf32>
    %162 = vector.broadcast %161 : vector<16x1xf32> to vector<16x32xf32>
    %163 = arith.subf %153, %162 : vector<16x32xf32>
    %164 = arith.mulf %163, %163 : vector<16x32xf32>
    %cst_83 = arith.constant dense<0.000000e+00> : vector<16xf32>
    %165 = vector.multi_reduction <add>, %164, %cst_83 [1] : vector<16x32xf32> to vector<16xf32>
    %166 = vector.shape_cast %165 : vector<16xf32> to vector<16x1xf32>
    %cst_84 = arith.constant 3.200000e+01 : f32
    %167 = vector.broadcast %cst_84 : f32 to vector<16x1xf32>
    %168 = arith.divf %166, %167 : vector<16x1xf32>
    %169 = vector.broadcast %161 : vector<16x1xf32> to vector<16x32xf32>
    %170 = arith.subf %153, %169 : vector<16x32xf32>
    %cst_85 = arith.constant 9.99999996E-13 : f32
    %171 = vector.broadcast %cst_85 : f32 to vector<16x1xf32>
    %172 = arith.addf %168, %171 : vector<16x1xf32>
    %173 = math.rsqrt %172 : vector<16x1xf32>
    %174 = vector.broadcast %173 : vector<16x1xf32> to vector<16x32xf32>
    %175 = arith.mulf %170, %174 : vector<16x32xf32>
    %176 = vector.broadcast %155 : vector<1x32xf32> to vector<16x32xf32>
    %177 = arith.mulf %175, %176 : vector<16x32xf32>
    %178 = vector.broadcast %157 : vector<1x32xf32> to vector<16x32xf32>
    %179 = arith.addf %177, %178 : vector<16x32xf32>
    %c1 = arith.constant 1 : index
    %c0_86 = arith.constant 0 : index
    %c0_87 = arith.constant 0 : index
    %180 = vector.load %arg9[%c1, %c0_86, %c0_87] : memref<2x32x96xf32, #tpu.memory_space<vmem>>, vector<1x32x96xf32>
    %181 = vector.shape_cast %180 : vector<1x32x96xf32> to vector<32x96xf32>
    %cst_88 = arith.constant dense<0.000000e+00> : vector<16x96xf32>
    %182 = tpu.matmul %179, %181, %cst_88 {dimension_numbers = #tpu.dot_dimension_numbers<[1], [0], [0], [1], [0, 0, 1, 1], [], []>} : vector<16x32xf32>, vector<32x96xf32>, vector<16x96xf32> -> vector<16x96xf32>
    %c1_89 = arith.constant 1 : index
    %c0_90 = arith.constant 0 : index
    %c0_91 = arith.constant 0 : index
    %183 = vector.load %arg10[%c1_89, %c0_90, %c0_91] : memref<2x1x96xf32, #tpu.memory_space<vmem>>, vector<1x1x96xf32>
    %184 = vector.shape_cast %183 : vector<1x1x96xf32> to vector<1x96xf32>
    %185 = vector.broadcast %184 : vector<1x96xf32> to vector<16x96xf32>
    %186 = arith.addf %182, %185 : vector<16x96xf32>
    %c1_92 = arith.constant 1 : index
    %c0_93 = arith.constant 0 : index
    %c0_94 = arith.constant 0 : index
    %187 = vector.load %arg11[%c1_92, %c0_93, %c0_94] : memref<2x32x32xf32, #tpu.memory_space<vmem>>, vector<1x32x32xf32>
    %188 = vector.shape_cast %187 : vector<1x32x32xf32> to vector<32x32xf32>
    %189 = vector.extract_strided_slice %186 {offsets = [0, 0], sizes = [16, 16], strides = [1, 1]} : vector<16x96xf32> to vector<16x16xf32>
    %190 = vector.extract_strided_slice %186 {offsets = [0, 32], sizes = [16, 16], strides = [1, 1]} : vector<16x96xf32> to vector<16x16xf32>
    %191 = vector.extract_strided_slice %186 {offsets = [0, 64], sizes = [16, 16], strides = [1, 1]} : vector<16x96xf32> to vector<16x16xf32>
    %cst_95 = arith.constant dense<0.000000e+00> : vector<16x16xf32>
    %192 = tpu.matmul %189, %190, %cst_95 {dimension_numbers = #tpu.dot_dimension_numbers<[1], [1], [0], [0], [0, 0, 1, 0], [], []>} : vector<16x16xf32>, vector<16x16xf32>, vector<16x16xf32> -> vector<16x16xf32>
    %cst_96 = arith.constant 2.500000e-01 : f32
    %193 = vector.broadcast %cst_96 : f32 to vector<16x16xf32>
    %194 = arith.mulf %192, %193 : vector<16x16xf32>
    %195 = arith.addf %194, %44 : vector<16x16xf32>
    %cst_97 = arith.constant dense<0xFF800000> : vector<16xf32>
    %196 = vector.multi_reduction <maximumf>, %195, %cst_97 [1] : vector<16x16xf32> to vector<16xf32>
    %197 = vector.shape_cast %196 : vector<16xf32> to vector<16x1xf32>
    %198 = vector.broadcast %197 : vector<16x1xf32> to vector<16x16xf32>
    %199 = arith.subf %195, %198 : vector<16x16xf32>
    %200 = math.exp %199 : vector<16x16xf32>
    %cst_98 = arith.constant dense<0.000000e+00> : vector<16xf32>
    %201 = vector.multi_reduction <add>, %200, %cst_98 [1] : vector<16x16xf32> to vector<16xf32>
    %202 = vector.shape_cast %201 : vector<16xf32> to vector<16x1xf32>
    %203 = tpu.reciprocal %202 {approx = true} : vector<16x1xf32> -> vector<16x1xf32>
    %204 = vector.broadcast %203 : vector<16x1xf32> to vector<16x16xf32>
    %205 = arith.mulf %200, %204 : vector<16x16xf32>
    %cst_99 = arith.constant dense<0.000000e+00> : vector<16x16xf32>
    %206 = tpu.matmul %205, %191, %cst_99 {dimension_numbers = #tpu.dot_dimension_numbers<[1], [0], [0], [1], [0, 0, 1, 1], [], []>} : vector<16x16xf32>, vector<16x16xf32>, vector<16x16xf32> -> vector<16x16xf32>
    %207 = vector.extract_strided_slice %188 {offsets = [0, 0], sizes = [16, 32], strides = [1, 1]} : vector<32x32xf32> to vector<16x32xf32>
    %cst_100 = arith.constant dense<0.000000e+00> : vector<16x32xf32>
    %208 = tpu.matmul %206, %207, %cst_100 {dimension_numbers = #tpu.dot_dimension_numbers<[1], [0], [0], [1], [0, 0, 1, 1], [], []>} : vector<16x16xf32>, vector<16x32xf32>, vector<16x32xf32> -> vector<16x32xf32>
    %209 = vector.extract_strided_slice %186 {offsets = [0, 16], sizes = [16, 16], strides = [1, 1]} : vector<16x96xf32> to vector<16x16xf32>
    %210 = vector.extract_strided_slice %186 {offsets = [0, 48], sizes = [16, 16], strides = [1, 1]} : vector<16x96xf32> to vector<16x16xf32>
    %211 = vector.extract_strided_slice %186 {offsets = [0, 80], sizes = [16, 16], strides = [1, 1]} : vector<16x96xf32> to vector<16x16xf32>
    %cst_101 = arith.constant dense<0.000000e+00> : vector<16x16xf32>
    %212 = tpu.matmul %209, %210, %cst_101 {dimension_numbers = #tpu.dot_dimension_numbers<[1], [1], [0], [0], [0, 0, 1, 0], [], []>} : vector<16x16xf32>, vector<16x16xf32>, vector<16x16xf32> -> vector<16x16xf32>
    %cst_102 = arith.constant 2.500000e-01 : f32
    %213 = vector.broadcast %cst_102 : f32 to vector<16x16xf32>
    %214 = arith.mulf %212, %213 : vector<16x16xf32>
    %215 = arith.addf %214, %44 : vector<16x16xf32>
    %cst_103 = arith.constant dense<0xFF800000> : vector<16xf32>
    %216 = vector.multi_reduction <maximumf>, %215, %cst_103 [1] : vector<16x16xf32> to vector<16xf32>
    %217 = vector.shape_cast %216 : vector<16xf32> to vector<16x1xf32>
    %218 = vector.broadcast %217 : vector<16x1xf32> to vector<16x16xf32>
    %219 = arith.subf %215, %218 : vector<16x16xf32>
    %220 = math.exp %219 : vector<16x16xf32>
    %cst_104 = arith.constant dense<0.000000e+00> : vector<16xf32>
    %221 = vector.multi_reduction <add>, %220, %cst_104 [1] : vector<16x16xf32> to vector<16xf32>
    %222 = vector.shape_cast %221 : vector<16xf32> to vector<16x1xf32>
    %223 = tpu.reciprocal %222 {approx = true} : vector<16x1xf32> -> vector<16x1xf32>
    %224 = vector.broadcast %223 : vector<16x1xf32> to vector<16x16xf32>
    %225 = arith.mulf %220, %224 : vector<16x16xf32>
    %cst_105 = arith.constant dense<0.000000e+00> : vector<16x16xf32>
    %226 = tpu.matmul %225, %211, %cst_105 {dimension_numbers = #tpu.dot_dimension_numbers<[1], [0], [0], [1], [0, 0, 1, 1], [], []>} : vector<16x16xf32>, vector<16x16xf32>, vector<16x16xf32> -> vector<16x16xf32>
    %227 = vector.extract_strided_slice %188 {offsets = [16, 0], sizes = [16, 32], strides = [1, 1]} : vector<32x32xf32> to vector<16x32xf32>
    %cst_106 = arith.constant dense<0.000000e+00> : vector<16x32xf32>
    %228 = tpu.matmul %226, %227, %cst_106 {dimension_numbers = #tpu.dot_dimension_numbers<[1], [0], [0], [1], [0, 0, 1, 1], [], []>} : vector<16x16xf32>, vector<16x32xf32>, vector<16x32xf32> -> vector<16x32xf32>
    %229 = arith.addf %208, %228 : vector<16x32xf32>
    %c1_107 = arith.constant 1 : index
    %c0_108 = arith.constant 0 : index
    %c0_109 = arith.constant 0 : index
    %230 = vector.load %arg12[%c1_107, %c0_108, %c0_109] : memref<2x1x32xf32, #tpu.memory_space<vmem>>, vector<1x1x32xf32>
    %231 = vector.shape_cast %230 : vector<1x1x32xf32> to vector<1x32xf32>
    %232 = vector.broadcast %231 : vector<1x32xf32> to vector<16x32xf32>
    %233 = arith.addf %229, %232 : vector<16x32xf32>
    %234 = arith.addf %233, %179 : vector<16x32xf32>
    %c1_110 = arith.constant 1 : index
    %c0_111 = arith.constant 0 : index
    %c0_112 = arith.constant 0 : index
    %235 = vector.load %arg13[%c1_110, %c0_111, %c0_112] : memref<2x1x32xf32, #tpu.memory_space<vmem>>, vector<1x1x32xf32>
    %236 = vector.shape_cast %235 : vector<1x1x32xf32> to vector<1x32xf32>
    %c1_113 = arith.constant 1 : index
    %c0_114 = arith.constant 0 : index
    %c0_115 = arith.constant 0 : index
    %237 = vector.load %arg14[%c1_113, %c0_114, %c0_115] : memref<2x1x32xf32, #tpu.memory_space<vmem>>, vector<1x1x32xf32>
    %238 = vector.shape_cast %237 : vector<1x1x32xf32> to vector<1x32xf32>
    %cst_116 = arith.constant dense<0.000000e+00> : vector<16xf32>
    %239 = vector.multi_reduction <add>, %234, %cst_116 [1] : vector<16x32xf32> to vector<16xf32>
    %240 = vector.shape_cast %239 : vector<16xf32> to vector<16x1xf32>
    %cst_117 = arith.constant 3.200000e+01 : f32
    %241 = vector.broadcast %cst_117 : f32 to vector<16x1xf32>
    %242 = arith.divf %240, %241 : vector<16x1xf32>
    %243 = vector.broadcast %242 : vector<16x1xf32> to vector<16x32xf32>
    %244 = arith.subf %234, %243 : vector<16x32xf32>
    %245 = arith.mulf %244, %244 : vector<16x32xf32>
    %cst_118 = arith.constant dense<0.000000e+00> : vector<16xf32>
    %246 = vector.multi_reduction <add>, %245, %cst_118 [1] : vector<16x32xf32> to vector<16xf32>
    %247 = vector.shape_cast %246 : vector<16xf32> to vector<16x1xf32>
    %cst_119 = arith.constant 3.200000e+01 : f32
    %248 = vector.broadcast %cst_119 : f32 to vector<16x1xf32>
    %249 = arith.divf %247, %248 : vector<16x1xf32>
    %250 = vector.broadcast %242 : vector<16x1xf32> to vector<16x32xf32>
    %251 = arith.subf %234, %250 : vector<16x32xf32>
    %cst_120 = arith.constant 9.99999996E-13 : f32
    %252 = vector.broadcast %cst_120 : f32 to vector<16x1xf32>
    %253 = arith.addf %249, %252 : vector<16x1xf32>
    %254 = math.rsqrt %253 : vector<16x1xf32>
    %255 = vector.broadcast %254 : vector<16x1xf32> to vector<16x32xf32>
    %256 = arith.mulf %251, %255 : vector<16x32xf32>
    %257 = vector.broadcast %236 : vector<1x32xf32> to vector<16x32xf32>
    %258 = arith.mulf %256, %257 : vector<16x32xf32>
    %259 = vector.broadcast %238 : vector<1x32xf32> to vector<16x32xf32>
    %260 = arith.addf %258, %259 : vector<16x32xf32>
    %c1_121 = arith.constant 1 : index
    %c0_122 = arith.constant 0 : index
    %c0_123 = arith.constant 0 : index
    %261 = vector.load %arg15[%c1_121, %c0_122, %c0_123] : memref<2x32x64xf32, #tpu.memory_space<vmem>>, vector<1x32x64xf32>
    %262 = vector.shape_cast %261 : vector<1x32x64xf32> to vector<32x64xf32>
    %cst_124 = arith.constant dense<0.000000e+00> : vector<16x64xf32>
    %263 = tpu.matmul %260, %262, %cst_124 {dimension_numbers = #tpu.dot_dimension_numbers<[1], [0], [0], [1], [0, 0, 1, 1], [], []>} : vector<16x32xf32>, vector<32x64xf32>, vector<16x64xf32> -> vector<16x64xf32>
    %c1_125 = arith.constant 1 : index
    %c0_126 = arith.constant 0 : index
    %c0_127 = arith.constant 0 : index
    %264 = vector.load %arg16[%c1_125, %c0_126, %c0_127] : memref<2x1x64xf32, #tpu.memory_space<vmem>>, vector<1x1x64xf32>
    %265 = vector.shape_cast %264 : vector<1x1x64xf32> to vector<1x64xf32>
    %266 = vector.broadcast %265 : vector<1x64xf32> to vector<16x64xf32>
    %267 = arith.addf %263, %266 : vector<16x64xf32>
    %cst_128 = arith.constant 5.000000e-01 : f32
    %268 = vector.broadcast %cst_128 : f32 to vector<16x64xf32>
    %269 = arith.mulf %268, %267 : vector<16x64xf32>
    %cst_129 = arith.constant 4.471500e-02 : f32
    %270 = vector.broadcast %cst_129 : f32 to vector<16x64xf32>
    %271 = arith.mulf %270, %267 : vector<16x64xf32>
    %272 = arith.mulf %271, %267 : vector<16x64xf32>
    %273 = arith.mulf %272, %267 : vector<16x64xf32>
    %274 = arith.addf %267, %273 : vector<16x64xf32>
    %cst_130 = arith.constant 0.797884583 : f32
    %275 = vector.broadcast %cst_130 : f32 to vector<16x64xf32>
    %276 = arith.mulf %275, %274 : vector<16x64xf32>
    %277 = math.tanh %276 : vector<16x64xf32>
    %cst_131 = arith.constant 1.000000e+00 : f32
    %278 = vector.broadcast %cst_131 : f32 to vector<16x64xf32>
    %279 = arith.addf %278, %277 : vector<16x64xf32>
    %280 = arith.mulf %269, %279 : vector<16x64xf32>
    %c1_132 = arith.constant 1 : index
    %c0_133 = arith.constant 0 : index
    %c0_134 = arith.constant 0 : index
    %281 = vector.load %arg17[%c1_132, %c0_133, %c0_134] : memref<2x64x32xf32, #tpu.memory_space<vmem>>, vector<1x64x32xf32>
    %282 = vector.shape_cast %281 : vector<1x64x32xf32> to vector<64x32xf32>
    %cst_135 = arith.constant dense<0.000000e+00> : vector<16x32xf32>
    %283 = tpu.matmul %280, %282, %cst_135 {dimension_numbers = #tpu.dot_dimension_numbers<[1], [0], [0], [1], [0, 0, 1, 1], [], []>} : vector<16x64xf32>, vector<64x32xf32>, vector<16x32xf32> -> vector<16x32xf32>
    %c1_136 = arith.constant 1 : index
    %c0_137 = arith.constant 0 : index
    %c0_138 = arith.constant 0 : index
    %284 = vector.load %arg18[%c1_136, %c0_137, %c0_138] : memref<2x1x32xf32, #tpu.memory_space<vmem>>, vector<1x1x32xf32>
    %285 = vector.shape_cast %284 : vector<1x1x32xf32> to vector<1x32xf32>
    %286 = vector.broadcast %285 : vector<1x32xf32> to vector<16x32xf32>
    %287 = arith.addf %283, %286 : vector<16x32xf32>
    %288 = arith.addf %287, %260 : vector<16x32xf32>
    %c1_139 = arith.constant 1 : index
    %c0_140 = arith.constant 0 : index
    %c0_141 = arith.constant 0 : index
    %289 = vector.load %arg19[%c1_139, %c0_140, %c0_141] : memref<2x1x32xf32, #tpu.memory_space<vmem>>, vector<1x1x32xf32>
    %290 = vector.shape_cast %289 : vector<1x1x32xf32> to vector<1x32xf32>
    %c1_142 = arith.constant 1 : index
    %c0_143 = arith.constant 0 : index
    %c0_144 = arith.constant 0 : index
    %291 = vector.load %arg20[%c1_142, %c0_143, %c0_144] : memref<2x1x32xf32, #tpu.memory_space<vmem>>, vector<1x1x32xf32>
    %292 = vector.shape_cast %291 : vector<1x1x32xf32> to vector<1x32xf32>
    %cst_145 = arith.constant dense<0.000000e+00> : vector<16xf32>
    %293 = vector.multi_reduction <add>, %288, %cst_145 [1] : vector<16x32xf32> to vector<16xf32>
    %294 = vector.shape_cast %293 : vector<16xf32> to vector<16x1xf32>
    %cst_146 = arith.constant 3.200000e+01 : f32
    %295 = vector.broadcast %cst_146 : f32 to vector<16x1xf32>
    %296 = arith.divf %294, %295 : vector<16x1xf32>
    %297 = vector.broadcast %296 : vector<16x1xf32> to vector<16x32xf32>
    %298 = arith.subf %288, %297 : vector<16x32xf32>
    %299 = arith.mulf %298, %298 : vector<16x32xf32>
    %cst_147 = arith.constant dense<0.000000e+00> : vector<16xf32>
    %300 = vector.multi_reduction <add>, %299, %cst_147 [1] : vector<16x32xf32> to vector<16xf32>
    %301 = vector.shape_cast %300 : vector<16xf32> to vector<16x1xf32>
    %cst_148 = arith.constant 3.200000e+01 : f32
    %302 = vector.broadcast %cst_148 : f32 to vector<16x1xf32>
    %303 = arith.divf %301, %302 : vector<16x1xf32>
    %304 = vector.broadcast %296 : vector<16x1xf32> to vector<16x32xf32>
    %305 = arith.subf %288, %304 : vector<16x32xf32>
    %cst_149 = arith.constant 9.99999996E-13 : f32
    %306 = vector.broadcast %cst_149 : f32 to vector<16x1xf32>
    %307 = arith.addf %303, %306 : vector<16x1xf32>
    %308 = math.rsqrt %307 : vector<16x1xf32>
    %309 = vector.broadcast %308 : vector<16x1xf32> to vector<16x32xf32>
    %310 = arith.mulf %305, %309 : vector<16x32xf32>
    %311 = vector.broadcast %290 : vector<1x32xf32> to vector<16x32xf32>
    %312 = arith.mulf %310, %311 : vector<16x32xf32>
    %313 = vector.broadcast %292 : vector<1x32xf32> to vector<16x32xf32>
    %314 = arith.addf %312, %313 : vector<16x32xf32>
    %c0_150 = arith.constant 0 : index
    %c0_151 = arith.constant 0 : index
    %315 = vector.load %arg21[%c0_150, %c0_151] : memref<32x128xf32, #tpu.memory_space<vmem>>, vector<32x128xf32>
    %cst_152 = arith.constant dense<0.000000e+00> : vector<16x128xf32>
    %316 = tpu.matmul %314, %315, %cst_152 {dimension_numbers = #tpu.dot_dimension_numbers<[1], [0], [0], [1], [0, 0, 1, 1], [], []>} : vector<16x32xf32>, vector<32x128xf32>, vector<16x128xf32> -> vector<16x128xf32>
    %c0_153 = arith.constant 0 : index
    %c0_154 = arith.constant 0 : index
    %317 = vector.load %arg22[%c0_153, %c0_154] : memref<1x128xf32, #tpu.memory_space<vmem>>, vector<1x128xf32>
    %318 = vector.broadcast %317 : vector<1x128xf32> to vector<16x128xf32>
    %319 = arith.addf %316, %318 : vector<16x128xf32>
    %c0_155 = arith.constant 0 : index
    %c0_156 = arith.constant 0 : index
    %320 = vector.load %arg23[%c0_155, %c0_156] : memref<16x128xf32, #tpu.memory_space<vmem>>, vector<16x128xf32>
    tpu.vector_store %arg23[%c0_155, %c0_156], %319 {strides = array<i32>} : memref<16x128xf32, #tpu.memory_space<vmem>>, vector<16x128xf32>,
    return
  }
  func.func @transform_0(%arg0: i32) -> (i32, i32) {
    %c0_i32 = arith.constant 0 : i32
    %c0_i32_0 = arith.constant 0 : i32
    %c0_i32_1 = arith.constant 0 : i32
    return %c0_i32, %c0_i32_0 : i32, i32
  }
  func.func @transform_1(%arg0: i32) -> (i32, i32) {
    %c0_i32 = arith.constant 0 : i32
    %c0_i32_0 = arith.constant 0 : i32
    %c0_i32_1 = arith.constant 0 : i32
    return %c0_i32, %c0_i32_0 : i32, i32
  }
  func.func @transform_2(%arg0: i32) -> (i32, i32) {
    %c0_i32 = arith.constant 0 : i32
    %c0_i32_0 = arith.constant 0 : i32
    %c0_i32_1 = arith.constant 0 : i32
    return %c0_i32, %c0_i32_0 : i32, i32
  }
  func.func @transform_3(%arg0: i32) -> (i32, i32) {
    %c0_i32 = arith.constant 0 : i32
    %c0_i32_0 = arith.constant 0 : i32
    %c0_i32_1 = arith.constant 0 : i32
    return %c0_i32, %c0_i32_0 : i32, i32
  }
  func.func @transform_4(%arg0: i32) -> (i32, i32) {
    %c0_i32 = arith.constant 0 : i32
    %c0_i32_0 = arith.constant 0 : i32
    %c0_i32_1 = arith.constant 0 : i32
    return %c0_i32, %c0_i32_0 : i32, i32
  }
  func.func @transform_5(%arg0: i32) -> (i32, i32) {
    %c0_i32 = arith.constant 0 : i32
    %c0_i32_0 = arith.constant 0 : i32
    %c0_i32_1 = arith.constant 0 : i32
    return %c0_i32, %c0_i32_0 : i32, i32
  }
  func.func @transform_6(%arg0: i32) -> (i32, i32) {
    %c0_i32 = arith.constant 0 : i32
    %c0_i32_0 = arith.constant 0 : i32
    %c0_i32_1 = arith.constant 0 : i32
    return %c0_i32, %c0_i32_0 : i32, i32
  }
  func.func @transform_7(%arg0: i32) -> (i32, i32) {
    %c0_i32 = arith.constant 0 : i32
    %c0_i32_0 = arith.constant 0 : i32
    %c0_i32_1 = arith.constant 0 : i32
    return %c0_i32, %c0_i32_0 : i32, i32
  }
  func.func @transform_8(%arg0: i32) -> (i32, i32, i32) {
    %c0_i32 = arith.constant 0 : i32
    %c0_i32_0 = arith.constant 0 : i32
    %c0_i32_1 = arith.constant 0 : i32
    %c0_i32_2 = arith.constant 0 : i32
    return %c0_i32, %c0_i32_0, %c0_i32_1 : i32, i32, i32
  }
  func.func @transform_9(%arg0: i32) -> (i32, i32, i32) {
    %c0_i32 = arith.constant 0 : i32
    %c0_i32_0 = arith.constant 0 : i32
    %c0_i32_1 = arith.constant 0 : i32
    %c0_i32_2 = arith.constant 0 : i32
    return %c0_i32, %c0_i32_0, %c0_i32_1 : i32, i32, i32
  }
  func.func @transform_10(%arg0: i32) -> (i32, i32, i32) {
    %c0_i32 = arith.constant 0 : i32
    %c0_i32_0 = arith.constant 0 : i32
    %c0_i32_1 = arith.constant 0 : i32
    %c0_i32_2 = arith.constant 0 : i32
    return %c0_i32, %c0_i32_0, %c0_i32_1 : i32, i32, i32
  }
  func.func @transform_11(%arg0: i32) -> (i32, i32, i32) {
    %c0_i32 = arith.constant 0 : i32
    %c0_i32_0 = arith.constant 0 : i32
    %c0_i32_1 = arith.constant 0 : i32
    %c0_i32_2 = arith.constant 0 : i32
    return %c0_i32, %c0_i32_0, %c0_i32_1 : i32, i32, i32
  }
  func.func @transform_12(%arg0: i32) -> (i32, i32, i32) {
    %c0_i32 = arith.constant 0 : i32
    %c0_i32_0 = arith.constant 0 : i32
    %c0_i32_1 = arith.constant 0 : i32
    %c0_i32_2 = arith.constant 0 : i32
    return %c0_i32, %c0_i32_0, %c0_i32_1 : i32, i32, i32
  }
  func.func @transform_13(%arg0: i32) -> (i32, i32, i32) {
    %c0_i32 = arith.constant 0 : i32
    %c0_i32_0 = arith.constant 0 : i32
    %c0_i32_1 = arith.constant 0 : i32
    %c0_i32_2 = arith.constant 0 : i32
    return %c0_i32, %c0_i32_0, %c0_i32_1 : i32, i32, i32
  }
  func.func @transform_14(%arg0: i32) -> (i32, i32, i32) {
    %c0_i32 = arith.constant 0 : i32
    %c0_i32_0 = arith.constant 0 : i32
    %c0_i32_1 = arith.constant 0 : i32
    %c0_i32_2 = arith.constant 0 : i32
    return %c0_i32, %c0_i32_0, %c0_i32_1 : i32, i32, i32
  }
  func.func @transform_15(%arg0: i32) -> (i32, i32, i32) {
    %c0_i32 = arith.constant 0 : i32
    %c0_i32_0 = arith.constant 0 : i32
    %c0_i32_1 = arith.constant 0 : i32
    %c0_i32_2 = arith.constant 0 : i32
    return %c0_i32, %c0_i32_0, %c0_i32_1 : i32, i32, i32
  }
  func.func @transform_16(%arg0: i32) -> (i32, i32, i32) {
    %c0_i32 = arith.constant 0 : i32
    %c0_i32_0 = arith.constant 0 : i32
    %c0_i32_1 = arith.constant 0 : i32
    %c0_i32_2 = arith.constant 0 : i32
    return %c0_i32, %c0_i32_0, %c0_i32_1 : i32, i32, i32
  }
  func.func @transform_17(%arg0: i32) -> (i32, i32, i32) {
    %c0_i32 = arith.constant 0 : i32
    %c0_i32_0 = arith.constant 0 : i32
    %c0_i32_1 = arith.constant 0 : i32
    %c0_i32_2 = arith.constant 0 : i32
    return %c0_i32, %c0_i32_0, %c0_i32_1 : i32, i32, i32
  }
  func.func @transform_18(%arg0: i32) -> (i32, i32, i32) {
    %c0_i32 = arith.constant 0 : i32
    %c0_i32_0 = arith.constant 0 : i32
    %c0_i32_1 = arith.constant 0 : i32
    %c0_i32_2 = arith.constant 0 : i32
    return %c0_i32, %c0_i32_0, %c0_i32_1 : i32, i32, i32
  }
  func.func @transform_19(%arg0: i32) -> (i32, i32, i32) {
    %c0_i32 = arith.constant 0 : i32
    %c0_i32_0 = arith.constant 0 : i32
    %c0_i32_1 = arith.constant 0 : i32
    %c0_i32_2 = arith.constant 0 : i32
    return %c0_i32, %c0_i32_0, %c0_i32_1 : i32, i32, i32
  }
  func.func @transform_20(%arg0: i32) -> (i32, i32) {
    %c0_i32 = arith.constant 0 : i32
    %c0_i32_0 = arith.constant 0 : i32
    %c0_i32_1 = arith.constant 0 : i32
    return %c0_i32, %c0_i32_0 : i32, i32
  }
  func.func @transform_21(%arg0: i32) -> (i32, i32) {
    %c0_i32 = arith.constant 0 : i32
    %c0_i32_0 = arith.constant 0 : i32
    %c0_i32_1 = arith.constant 0 : i32
    return %c0_i32, %c0_i32_0 : i32, i32
  }
  func.func @transform_22(%arg0: i32) -> (i32, i32) {
    %c0_i32 = arith.constant 0 : i32
    %c0_i32_0 = arith.constant 0 : i32
    %c0_i32_1 = arith.constant 0 : i32
    return %c0_i32, %c0_i32_0 : i32, i32
  }
}

</mosaic_0001>

<bundles_post_ra>
// kernel: eq.8
= control target key start
LH: loop header
LB: loop body
LE: loop exit
PB: predicated region body
PF: predicated region fallthrough
CT: control target
= control target key end

     0   :  { %vm7_vm0 = vcmask 64512   ;;  %vm13_vm1 = vcmask 130112   ;;  %s39_s0 = inlined_call_operand.vmem [shape: s32[2,8], index: 0, kind: input, shape index: {}]   ;;  %s40_s1 = inlined_call_operand.vmem [shape: s32[16], index: 1, kind: output, shape index: {}]  }
   0x1   :  { %v4_v0 = vld [vmem:[%s39_s0] sm:$0x3]  ;;  %s22_s0 = smov 8  }
   0x2   :  { %5 = vst [vmem:[#allocation1] sm:$0x3] %v4_v0 }
   0x9   :  { %v10_v1 = vld [vmem:[#allocation1 + $0x1] sm:$0x1]   ;;  %v6_v2 = vld [vmem:[#allocation1] sm:$0x1]  }
   0xa   :  { %11 = vrot.lane.b32.xlu0 %v10_v1, %s22_s0  ;;  %8 = vst.msk [vmem:[#allocation0] sm:$0x1] %vm7_vm0, %v6_v2  }
  0x7c   :  { %v12_v3 = vpop.permute.xlu0 %11  }
  0x7d   :  { %14 = vst.msk [vmem:[#allocation0] sm:$0x1] %vm13_vm1, %v12_v3  }
  0x84   :  { %v18_v4 = vld [vmem:[#allocation0] sm:$0x1] }
  0x85   :  { %20 = vst [vmem:[%s40_s1] sm:$0x1] %v18_v4 }

// kernel: tile.0
= control target key start
LH: loop header
LB: loop body
LE: loop exit
PB: predicated region body
PF: predicated region fallthrough
CT: control target
= control target key end

     0   :  { %s66_s8 = smov 125   ;;  %vm7_vm0 = vcmask 7168   ;;  %s67_s11 = smov 126   ;;  %s117_s0 = inlined_call_operand.vmem [shape: s32[2,8], index: 0, kind: input, shape index: {}]   ;;  %s118_s1 = inlined_call_operand.vmem [shape: s32[16,1], index: 1, kind: output, shape index: {}]  }
   0x1   :  { %v4_v0 = vld [vmem:[%s117_s0] sm:$0x3]  ;;  %s65_s0 = smov 127   ;;  %s68_s12 = smov 124  }
   0x2   :  { %5 = vst [vmem:[#allocation0] sm:$0x3] %v4_v0  ;;  %s69_s13 = smov 123   ;;  %s70_s14 = smov 122  }
   0x3   :  { %s71_s15 = smov 121  }
   0x9   :  { %v9_v1 = vld [vmem:[#allocation0] sm:$0x3]  }
   0xa   :  { %v21_v2 = vld [vmem:[#allocation0] sm:$0x3]   ;;  %10 = vrot.lane.b32.xlu0 %v9_v1, %s65_s0 }
   0xb   :  { %22 = vrot.lane.b32.xlu1 %v21_v2, %s66_s8  ;;  %v15_v3 = vld [vmem:[#allocation0] sm:$0x3]  }
   0xc   :  { %v27_v4 = vld [vmem:[#allocation0] sm:$0x3]  }
   0xd   :  { %v6_v5 = vld [vmem:[#allocation0] sm:$0x3]  }
   0xe   :  { %8 = vst.msk [vmem:[%s118_s1] ss:$8 sm:$0x3] %vm7_vm0, %v6_v5   ;;  %16 = vrot.lane.b32.xlu0 %v15_v3, %s67_s11  ;;  %v33_v6 = vld [vmem:[#allocation0] sm:$0x3]  }
   0xf   :  { %28 = vrot.lane.b32.xlu1 %v27_v4, %s68_s12  ;;  %v39_v7 = vld [vmem:[#allocation0] sm:$0x3]  }
  0x10   :  { %v45_v8 = vld [vmem:[#allocation0] sm:$0x3]  }
  0x12   :  { %34 = vrot.lane.b32.xlu0 %v33_v6, %s69_s13 }
  0x13   :  { %40 = vrot.lane.b32.xlu1 %v39_v7, %s70_s14 }
  0x16   :  { %46 = vrot.lane.b32.xlu0 %v45_v8, %s71_s15 }
  0x7c   :  { %v11_v9 = vpop.permute.xlu0 %10  }
  0x7d   :  { %v23_v10 = vpop.permute.xlu1 %22   ;;  %51 = vst.msk [vmem:[%s118_s1 + $0x1] ss:$8 sm:$0x3] %vm7_vm0, %v11_v9  }
  0x7e   :  { %53 = vst.msk [vmem:[%s118_s1 + $0x3] ss:$8 sm:$0x3] %vm7_vm0, %v23_v10  }
  0x80   :  { %v17_v11 = vpop.permute.xlu0 %16  }
  0x81   :  { %v29_v12 = vpop.permute.xlu1 %28   ;;  %52 = vst.msk [vmem:[%s118_s1 + $0x2] ss:$8 sm:$0x3] %vm7_vm0, %v17_v11  }
  0x82   :  { %54 = vst.msk [vmem:[%s118_s1 + $0x4] ss:$8 sm:$0x3] %vm7_vm0, %v29_v12  }
  0x84   :  { %v35_v13 = vpop.permute.xlu0 %34  }
  0x85   :  { %v41_v14 = vpop.permute.xlu1 %40   ;;  %55 = vst.msk [vmem:[%s118_s1 + $0x5] ss:$8 sm:$0x3] %vm7_vm0, %v35_v13  }
  0x86   :  { %56 = vst.msk [vmem:[%s118_s1 + $0x6] ss:$8 sm:$0x3] %vm7_vm0, %v41_v14  }
  0x88   :  { %v47_v15 = vpop.permute.xlu0 %46  }
  0x89   :  { %57 = vst.msk [vmem:[%s118_s1 + $0x7] ss:$8 sm:$0x3] %vm7_vm0, %v47_v15  }

// kernel: bert_regression_forward.1
= control target key start
LH: loop header
LB: loop body
LE: loop exit
PB: predicated region body
PF: predicated region fallthrough
CT: control target
= control target key end

     0   :  { %v3062_v0 = vmov 0   ;;  %v71_v11 = vlaneseq  ;;  %vm111_vm0 = vcmask 130048   ;;  %v3063_v15 = vmov 0.0   ;;  %s3582_s1 = inlined_call_operand.vmem [shape: s32[16,1], index: 1, kind: input, shape index: {}]   ;;  %s3583_s0 = inlined_call_operand.vmem [shape: s32[16,1], index: 0, kind: input, shape index: {}]   ;;  %s3584_s4 = inlined_call_operand.vmem [shape: f32[16,32], index: 4, kind: input, shape index: {}]   ;;  %s3585_s3 = inlined_call_operand.vmem [shape: f32[64,32], index: 3, kind: input, shape index: {}]   ;;  %s3586_s5 = inlined_call_operand.vmem [shape: f32[2,32], index: 5, kind: input, shape index: {}]   ;;  %s3587_s8 = inlined_call_operand.vmem [shape: f32[2,32,96], index: 8, kind: input, shape index: {}]   ;;  %s3588_s6 = inlined_call_operand.vmem [shape: f32[1,32], index: 6, kind: input, shape index: {}]   ;;  %s3589_s7 = inlined_call_operand.vmem [shape: f32[1,32], index: 7, kind: input, shape index: {}]   ;;  %s3590_s9 = inlined_call_operand.vmem [shape: f32[2,1,96], index: 9, kind: input, shape index: {}]   ;;  %s3591_s2 = inlined_call_operand.vmem [shape: f32[16,16], index: 2, kind: input, shape index: {}]   ;;  %s3592_s10 = inlined_call_operand.vmem [shape: f32[2,32,32], index: 10, kind: input, shape index: {}]   ;;  %s3593_s11 = inlined_call_operand.vmem [shape: f32[2,1,32], index: 11, kind: input, shape index: {}]   ;;  %s3594_s14 = inlined_call_operand.vmem [shape: f32[2,32,64], index: 14, kind: input, shape index: {}]   ;;  %s3595_s12 = inlined_call_operand.vmem [shape: f32[2,1,32], index: 12, kind: input, shape index: {}]   ;;  %s3596_s13 = inlined_call_operand.vmem [shape: f32[2,1,32], index: 13, kind: input, shape index: {}]   ;;  %s3597_s16 = inlined_call_operand.vmem [shape: f32[2,64,32], index: 16, kind: input, shape index: {}]   ;;  %s3598_s15 = inlined_call_operand.vmem [shape: f32[2,1,64], index: 15, kind: input, shape index: {}]   ;;  %s3599_s17 = inlined_call_operand.vmem [shape: f32[2,1,32], index: 17, kind: input, shape index: {}]   ;;  %s3600_s18 = inlined_call_operand.vmem [shape: f32[2,1,32], index: 18, kind: input, shape index: {}]   ;;  %s3601_s19 = inlined_call_operand.vmem [shape: f32[2,1,32], index: 19, kind: input, shape index: {}]   ;;  %s3602_s20 = inlined_call_operand.vmem [shape: f32[32,128], index: 20, kind: input, shape index: {}]   ;;  %s3603_s21 = inlined_call_operand.vmem [shape: f32[1,128], index: 21, kind: input, shape index: {}]   ;;  %s3604_s22 = inlined_call_operand.vmem [shape: f32[16,128], index: 22, kind: output, shape index: {}]  }
   0x1   :  { %3610 = sst [smem:[#allocation2_spill]] %s3582_s1  ;;  %2960 = vset.pattern.permute.xlu0 %v3062_v0  ;;  %2961 = vset.pattern.permute.xlu1 %v3062_v0  ;;  %vm194_vm4 = vcmask 523264   ;;  %vm284_vm6 = vcmask 261120   ;;  %v2392_v63 = vld [vmem:[%s3589_s7] ss:$0 sm:$0xff]  ;;  %s3064_s7 = smov 80   ;;  %vm3277_vm7 = vmpackc.low %vm111_vm0, %vm111_vm0 }
   0x2   :  { %3611 = sst [smem:[#allocation3_spill]] %s3583_s0  ;;  %s3617_s29 = sld [smem:[#allocation2_spill]]  ;;  %v72_v12 = vand.u32 127, %v71_v11 }
   0x3   :  { %3612 = sst [smem:[#allocation4_spill]] %s3584_s4  ;;  %s3618_s1 = sld [smem:[#allocation3_spill]] }
   0x4   :  { %3613 = sst [smem:[#allocation5_spill]] %s3585_s3  ;;  %s3068_s4 = smov 48  }
   0x5   :  { %3614 = sst [smem:[#allocation6_spill]] %s3586_s5  ;;  %s3620_s30 = sld [smem:[#allocation5_spill]] }
   0x6   :  { %3615 = sst [smem:[#allocation7_spill]] %s3587_s8  ;;  %s3619_s8 = sld [smem:[#allocation4_spill]] }
   0x7   :  { %3616 = sst [smem:[#allocation8_spill]] %s3588_s6  ;;  %s3622_s0 = sld [smem:[#allocation7_spill]] }
   0x8   :  { %v95_v1 = vld [vmem:[%s3617_s29] sm:$0xff]  ;;  %v96_v5 = vld [vmem:[%s3617_s29 + $0x8] sm:$0xff]  ;;  %s3621_s29 = sld [smem:[#allocation6_spill]]  ;;  %s3623_s28 = sld [smem:[#allocation8_spill]] }
   0x9   :  { %v73_v2 = vld [vmem:[%s3618_s1] sm:$0xff]  ;;  %98 = vperm.xlu0 %2960, %v95_v1   ;;  %v74_v6 = vld [vmem:[%s3618_s1 + $0x8] sm:$0xff]  ;;  %s3065_s1 = smov 96  }
   0xa   :  { %76 = vperm.xlu1 %2961, %v73_v2  }
   0xb   :  { %v87_v8 = vld [vmem:[%s3620_s30] sm:$0xff]  ;;  %v88_v9 = vld [vmem:[%s3620_s30 + $0x8] sm:$0xff]  ;;  %v89_v17 = vld [vmem:[%s3620_s30 + $0x10] sm:$0xff] }
   0xc   :  { %v109_v3 = vld [vmem:[%s3619_s8] sm:$0xff]  ;;  %v110_v4 = vld [vmem:[%s3619_s8 + $0x8] sm:$0xff]  ;;  %v2803_v10 = vpack.c.bf16 %v88_v9, %v87_v8  ;;  %v90_v18 = vld [vmem:[%s3620_s30 + $0x18] sm:$0xff]  ;;  %s3066_s8 = smov 112  }
   0xd   :  { %v2799_v7 = vpack.c.bf16 %v110_v4, %v109_v3  ;;  %101 = vperm.xlu0 %2960, %v96_v5   ;;  %v2807_v20 = vpack.c.bf16 %v90_v18, %v89_v17  ;;  %v91_v23 = vld [vmem:[%s3620_s30 + $0x20] sm:$0xff]  ;;  %v92_v24 = vld [vmem:[%s3620_s30 + $0x28] sm:$0xff]  ;;  %v93_v26 = vld [vmem:[%s3620_s30 + $0x30] sm:$0xff] }
   0xe   :  { %79 = vperm.xlu1 %2961, %v74_v6   ;;  %v2811_v25 = vpack.c.bf16 %v92_v24, %v91_v23  ;;  %v94_v27 = vld [vmem:[%s3620_s30 + $0x38] sm:$0xff]  ;;  %v2390_v31 = vld [vmem:[%s3621_s29] ss:$0 sm:$0xff]  ;;  %v331_v49 = vld [vmem:[%s3622_s0 + $0x8] sm:$0xff] }
   0xf   :  { %2800 = vmatprep.subr.bf16.mxu0 %v2799_v7  ;;  %v2815_v28 = vpack.c.bf16 %v94_v27, %v93_v26  ;;  %v330_v48 = vld [vmem:[%s3622_s0] sm:$0xff]  ;;  %v332_v50 = vld [vmem:[%s3622_s0 + $0x10] sm:$0xff]  ;;  %v333_v52 = vld [vmem:[%s3622_s0 + $0x18] sm:$0xff] }
  0x10   :  { %2802 = vmatpush3.bf16.msra.mxu0 %v2799_v7  ;;  %v2819_v51 = vpack.c.bf16 %v331_v49, %v330_v48  ;;  %v2823_v53 = vpack.c.bf16 %v333_v52, %v332_v50  ;;  %v2391_v61 = vld [vmem:[%s3623_s28] ss:$0 sm:$0xff]  ;;  %v3295_v24 = vld [vmem:[%s3591_s2 + $0x8] sm:$0xff] }
  0x11   :  { %2804 = vmatprep.subr.bf16.mxu0 %v2803_v10  ;;  %v2393_v6 = vld [vmem:[%s3590_s9] ss:$0 sm:$0xff] }
  0x12   :  { %2820 = vmatprep.subr.bf16.mxu1 %v2819_v51 }
  0x13   :  { %2822 = vmatpush3.bf16.msra.mxu1 %v2819_v51 }
  0x14   :  { %2824 = vmatprep.subr.bf16.mxu1 %v2823_v53 }
  0x17   :  { %2826 = vmatpush3.bf16.msra.mxu1 %v2823_v53 }
  0x88   :  { %v99_v13 = vpop.permute.xlu0 %98 }
  0x89   :  { %vm103_vm1 = vcmp.eq.s32.totalorder %v72_v12, %v99_v13  ;;  %v77_v14 = vpop.permute.xlu1 %76 }
  0x8a   :  { %v2384_v16 = vsel %vm103_vm1, 1.0, %v3063_v15  ;;  %vm81_vm2 = vcmp.eq.s32.totalorder %v72_v12, %v77_v14 }
  0x8b   :  { %2600 = vmatprep.mubr.msk.f32.mxu0 %vm111_vm0, %v2384_v16  ;;  %v2382_v21 = vsel %vm81_vm2, 1.0, %v3063_v15 }
  0x8c   :  { %v102_v19 = vpop.permute.xlu0 %101 }
  0x8d   :  { %vm104_vm3 = vcmp.eq.s32.totalorder %v72_v12, %v102_v19  ;;  %v80_v29 = vpop.permute.xlu1 %79 }
  0x8e   :  { %v2385_v22 = vsel %vm104_vm3, 1.0, %v3063_v15  ;;  %vm82_vm5 = vcmp.eq.s32.totalorder %v72_v12, %v80_v29 }
  0x8f   :  { %2601 = vmatmul.mubr.msk.f32.vlgmr.msra.gmra.mrb[0].mxu0 %vm111_vm0, %v2385_v22  ;;  %v2383_v30 = vsel %vm82_vm5, 1.0, %v3063_v15 }
  0x90   :  { %2806 = vmatpush3.bf16.msra.mxu0 %v2803_v10  ;;  %2619 = vmatprep.mubr.msk.f32.mxu0 %vm194_vm4, %v2382_v21 }
  0x91   :  { %2808 = vmatprep.subr.bf16.mxu0 %v2807_v20 }
  0x94   :  { %2810 = vmatpush3.bf16.msra.mxu0 %v2807_v20 }
  0x95   :  { %2812 = vmatprep.subr.bf16.mxu0 %v2811_v25 }
  0x98   :  { %2814 = vmatpush3.bf16.msra.mxu0 %v2811_v25 }
  0x99   :  { %2816 = vmatprep.subr.bf16.mxu0 %v2815_v28 }
  0x9c   :  { %2818 = vmatpush3.bf16.msra.mxu0 %v2815_v28  ;;  %v3300_v28 = vld [vmem:[%s3591_s2] sm:$0xff]  ;;  %s3067_s2 = smov 64  }
  0x9f   :  { %2620 = vmatmul.mubr.msk.f32.vlgmr.msra.gmra.mrb[0].mxu0 %vm194_vm4, %v2383_v30 }
 0x172   :  { %v2621_v32 = vpop.f32.mrb[0].mxu0 }
 0x173   :  { %v281_v33 = vadd.f32 %v2621_v32, %v2390_v31  ;;  %v267_v34 = vpop.f32.mrb[1].mxu0 }
 0x174   :  { %v280_v35 = vadd.f32 %v2390_v31, %v267_v34 }
 0x175   :  { %v288_v36 = vsel %vm284_vm6, %v281_v33, 0.0 }
 0x176   :  { %289 = vadd.xlane.f32.xlu1 %v288_v36  ;;  %v285_v37 = vsel %vm284_vm6, %v280_v35, 0.0 }
 0x177   :  { %286 = vadd.xlane.f32.xlu0 %v285_v37 }
 0x203   :  { %v290_v38 = vpop.xlane.xlu1 %289 }
 0x204   :  { %v293_v39 = vmul.f32 0.03125, %v290_v38  ;;  %v287_v40 = vpop.xlane.xlu0 %286 }
 0x205   :  { %v292_v41 = vmul.f32 0.03125, %v287_v40 }
 0x206   :  { %v295_v42 = vsub.f32 %v281_v33, %v293_v39 }
 0x207   :  { %v294_v43 = vsub.f32 %v280_v35, %v292_v41 }
 0x208   :  { %v297_v46 = vmul.f32 %v295_v42, %v295_v42 }
 0x209   :  { %v296_v44 = vmul.f32 %v294_v43, %v294_v43 }
 0x20a   :  { %v301_v47 = vsel %vm284_vm6, %v297_v46, 0.0 }
 0x20b   :  { %v298_v45 = vsel %vm284_vm6, %v296_v44, 0.0 }
 0x20c   :  { %299 = vadd.xlane.f32.xlu0 %v298_v45 }
 0x210   :  { %302 = vadd.xlane.f32.xlu0 %v301_v47 }
 0x299   :  { %v300_v54 = vpop.xlane.xlu0 %299 }
 0x29a   :  { %v304_v55 = vmul.f32 0.03125, %v300_v54 }
 0x29c   :  { %v306_v56 = vadd.f32 1e-12, %v304_v55 }
 0x29d   :  { %v303_v57 = vpop.xlane.xlu0 %302 }
 0x29e   :  { %3002 = vrsqrt.f32 %v306_v56  ;;  %v305_v58 = vmul.f32 0.03125, %v303_v57 }
 0x2a0   :  { %v307_v59 = vadd.f32 1e-12, %v305_v58 }
 0x2a2   :  { %3004 = vrsqrt.f32 %v307_v59 }
 0x2a8   :  { %v3003_v60 = vpop.eup %3002 }
 0x2a9   :  { %v310_v62 = vmul.f32 %v3003_v60, %v294_v43 }
 0x2ab   :  { %v318_v0 = vmul.f32 %v2391_v61, %v310_v62 }
 0x2ac   :  { %v3005_v1 = vpop.eup %3004 }
 0x2ad   :  { %v311_v2 = vmul.f32 %v3005_v1, %v295_v42  ;;  %v3255_v3 = vadd.f32 %v2392_v63, %v318_v0 }
 0x2af   :  { %v319_v4 = vmul.f32 %v2391_v61, %v311_v2  ;;  %2630 = vmatprep.mubr.msk.f32.mxu1 %vm284_vm6, %v3255_v3 }
 0x2b1   :  { %v3259_v5 = vadd.f32 %v2392_v63, %v319_v4 }
 0x2b3   :  { %2631 = vmatmul.mubr.msk.f32.vlgmr.msra.gmra.mrb[0].mxu1 %vm284_vm6, %v3259_v5 }
 0x386   :  { %v2632_v7 = vpop.f32.mrb[0].mxu1 }
 0x387   :  { %v419_v8 = vadd.f32 %v2632_v7, %v2393_v6  ;;  %v413_v9 = vpop.f32.mrb[1].mxu1 }
 0x388   :  { %v414_v10 = vadd.f32 %v2393_v6, %v413_v9 }
 0x38a   :  { %2637 = vmatprep.mubr.msk.f32.mxu1 %vm111_vm0, %v414_v10  ;;  %v3267_v11 = vpack.i.bf16 %v419_v8, %v414_v10 }
 0x38c   :  { %2968 = vrot.lane.b32.xlu0 %v3267_v11, %s3064_s7  ;;  %2963 = vrot.lane.b32.xlu1 %v3267_v11, %s3065_s1 }
 0x390   :  { %628 = vrot.lane.b32.xlu1 %v414_v10, %s3066_s8 }
 0x394   :  { %630 = vrot.lane.b32.xlu1 %v419_v8, %s3066_s8 }
 0x3fe   :  { %v2969_v12 = vpop.permute.xlu0 %2968  ;;  %v2964_v13 = vpop.permute.xlu1 %2963 }
 0x3ff   :  { %v2971_v14 = vunpack.i.h.bf16 %v2969_v12  ;;  %v2970_v15 = vunpack.i.l.bf16 %v2969_v12  ;;  %v2966_v16 = vunpack.i.h.bf16 %v2964_v13  ;;  %v2965_v17 = vunpack.i.l.bf16 %v2964_v13 }
 0x401   :  { %v2837_v19 = vpack.c.bf16 %v2971_v14, %v2970_v15  ;;  %v2827_v20 = vpack.c.bf16 %v2966_v16, %v2965_v17 }
 0x402   :  { %v629_v21 = vpop.permute.xlu1 %628 }
 0x403   :  { %2829 = vmatprep.subr.msk.bf16.mxu1 %vm3277_vm7, %v2827_v20  ;;  %2839 = vmatprep.subr.msk.bf16.mxu0 %vm3277_vm7, %v2837_v19 }
 0x404   :  { %2651 = vmatprep.mubr.msk.f32.mxu0 %vm111_vm0, %v629_v21  ;;  %2832 = vmatpush3.bf16.xpose.msk.msra.mxu1 %vm3277_vm7, %v2827_v20  ;;  %v424_v20 = vld [vmem:[%s3592_s10 + $0x10] sm:$0xff]  ;;  %v425_v21 = vld [vmem:[%s3592_s10 + $0x18] sm:$0xff] }
 0x405   :  { %2842 = vmatpush3.bf16.xpose.msk.msra.mxu0 %vm3277_vm7, %v2837_v19 }
 0x406   :  { %v631_v22 = vpop.permute.xlu1 %630 }
 0x40b   :  { %2638 = vmatmul.mubr.msk.f32.vlgmr.msra.gmra.mrb[2].mxu1 %vm111_vm0, %v419_v8 }
 0x40c   :  { %2652 = vmatmul.mubr.msk.f32.vlgmr.msra.gmra.mrb[2].mxu0 %vm111_vm0, %v631_v22  ;;  %v2847_v22 = vpack.c.bf16 %v425_v21, %v424_v20  ;;  %v1166_v20 = vld [vmem:[%s3597_s16 + $0x38] sm:$0xff] }
 0x4de   :  { %v2639_v23 = vpop.f32.mrb[2].mxu1 }
 0x4df   :  { %v516_v25 = vmul.f32 0.25, %v2639_v23  ;;  %v2653_v26 = vpop.f32.mrb[2].mxu0  ;;  %v506_v27 = vpop.f32.mrb[3].mxu1  ;;  %v422_v23 = vld [vmem:[%s3592_s10] sm:$0xff] }
 0x4e0   :  { %v515_v29 = vmul.f32 0.25, %v506_v27  ;;  %v710_v30 = vpop.f32.mrb[3].mxu0  ;;  %v720_v35 = vmul.f32 0.25, %v2653_v26 }
 0x4e1   :  { %v719_v31 = vmul.f32 0.25, %v710_v30  ;;  %v518_v32 = vadd.f32 %v516_v25, %v3295_v24  ;;  %v423_v25 = vld [vmem:[%s3592_s10 + $0x8] sm:$0xff] }
 0x4e2   :  { %v517_v33 = vadd.f32 %v515_v29, %v3300_v28  ;;  %v722_v39 = vadd.f32 %v720_v35, %v3295_v24  ;;  %v2851_v26 = vpack.c.bf16 %v423_v25, %v422_v23 }
 0x4e3   :  { %v522_v34 = vsel %vm111_vm0, %v518_v32, -inf  ;;  %v721_v37 = vadd.f32 %v719_v31, %v3300_v28 }
 0x4e4   :  { %523 = vmax.xlane.f32.xlu1 %v522_v34  ;;  %v519_v36 = vsel %vm111_vm0, %v517_v33, -inf  ;;  %v726_v40 = vsel %vm111_vm0, %v722_v39, -inf }
 0x4e5   :  { %520 = vmax.xlane.f32.xlu0 %v519_v36  ;;  %v723_v38 = vsel %vm111_vm0, %v721_v37, -inf }
 0x4e9   :  { %724 = vmax.xlane.f32.xlu0 %v723_v38 }
 0x4ed   :  { %727 = vmax.xlane.f32.xlu0 %v726_v40 }
 0x571   :  { %v524_v41 = vpop.xlane.xlu1 %523 }
 0x572   :  { %v526_v42 = vsub.f32 %v518_v32, %v524_v41  ;;  %v521_v43 = vpop.xlane.xlu0 %520  ;;  %v2412_v32 = vld [vmem:[%s3593_s11] ss:$0 sm:$0xff] }
 0x573   :  { %v525_v44 = vsub.f32 %v517_v33, %v521_v43 }
 0x574   :  { %v529_v45 = vmul.f32 1.442695, %v526_v42 }
 0x575   :  { %v527_v46 = vmul.f32 1.442695, %v525_v44 }
 0x576   :  { %3006 = vpow2.f32 %v529_v45  ;;  %v725_v47 = vpop.xlane.xlu0 %724 }
 0x577   :  { %3008 = vpow2.f32 %v527_v46  ;;  %v729_v48 = vsub.f32 %v721_v37, %v725_v47 }
 0x579   :  { %v731_v49 = vmul.f32 1.442695, %v729_v48 }
 0x57a   :  { %v728_v50 = vpop.xlane.xlu0 %727 }
 0x57b   :  { %3010 = vpow2.f32 %v731_v49  ;;  %v730_v51 = vsub.f32 %v722_v39, %v728_v50  ;;  %v1050_v50 = vld [vmem:[%s3594_s14 + $0x8] sm:$0xff] }
 0x57d   :  { %v733_v52 = vmul.f32 1.442695, %v730_v51 }
 0x57f   :  { %3012 = vpow2.f32 %v733_v52  ;;  %v1051_v52 = vld [vmem:[%s3594_s14 + $0x10] sm:$0xff] }
 0x580   :  { %v3007_v53 = vpop.eup %3006 }
 0x581   :  { %v3009_v54 = vpop.eup %3008  ;;  %v534_v55 = vsel %vm111_vm0, %v3007_v53, 0.0 }
 0x582   :  { %535 = vadd.xlane.f32.xlu0 %v534_v55  ;;  %v531_v56 = vsel %vm111_vm0, %v3009_v54, 0.0 }
 0x583   :  { %532 = vadd.xlane.f32.xlu1 %v531_v56 }
 0x585   :  { %v3011_v57 = vpop.eup %3010 }
 0x586   :  { %v735_v58 = vsel %vm111_vm0, %v3011_v57, 0.0 }
 0x587   :  { %736 = vadd.xlane.f32.xlu1 %v735_v58 }
 0x589   :  { %v3013_v59 = vpop.eup %3012 }
 0x58a   :  { %v738_v60 = vsel %vm111_vm0, %v3013_v59, 0.0 }
 0x58b   :  { %739 = vadd.xlane.f32.xlu0 %v738_v60 }
 0x598   :  { %2973 = vrot.lane.b32.xlu1 %v3267_v11, %s3067_s2 }
 0x5a1   :  { %2978 = vrot.lane.b32.xlu0 %v3267_v11, %s3068_s4 }
 0x60f   :  { %v536_v61 = vpop.xlane.xlu0 %535 }
 0x610   :  { %v533_v62 = vpop.xlane.xlu1 %532 }
 0x611   :  { %3014 = vrcp.f32 %v533_v62  ;;  %v2413_v62 = vld [vmem:[%s3595_s12] ss:$0 sm:$0xff] }
 0x612   :  { %3016 = vrcp.f32 %v536_v61 }
 0x614   :  { %v737_v63 = vpop.xlane.xlu1 %736 }
 0x615   :  { %3018 = vrcp.f32 %v737_v63 }
 0x618   :  { %v2974_v0 = vpop.permute.xlu1 %2973  ;;  %v740_v1 = vpop.xlane.xlu0 %739 }
 0x619   :  { %v2976_v2 = vunpack.i.h.bf16 %v2974_v0  ;;  %v2975_v4 = vunpack.i.l.bf16 %v2974_v0  ;;  %3020 = vrcp.f32 %v740_v1 }
 0x61b   :  { %v3015_v6 = vpop.eup %3014  ;;  %v2833_v7 = vpack.c.bf16 %v2976_v2, %v2975_v4  ;;  %v2414_v2 = vld [vmem:[%s3596_s13] ss:$0 sm:$0xff] }
 0x61c   :  { %v3017_v8 = vpop.eup %3016  ;;  %v2979_v9 = vpop.permute.xlu0 %2978  ;;  %v539_v10 = vmul.f32 %v3015_v6, %v3009_v54 }
 0x61d   :  { %v2981_v12 = vunpack.i.h.bf16 %v2979_v9  ;;  %v2980_v13 = vunpack.i.l.bf16 %v2979_v9  ;;  %2834 = vmatprep.subr.bf16.mxu1 %v2833_v7  ;;  %v540_v14 = vmul.f32 %v3017_v8, %v3007_v53  ;;  %v1052_v53 = vld [vmem:[%s3594_s14 + $0x18] sm:$0xff]  ;;  %v1159_v9 = vld [vmem:[%s3597_s16] sm:$0xff] }
 0x61e   :  { %2836 = vmatpush3.bf16.msra.mxu1 %v2833_v7  ;;  %2644 = vmatprep.mubr.msk.f32.mxu1 %vm111_vm0, %v539_v10  ;;  %v2859_v54 = vpack.c.bf16 %v1052_v53, %v1051_v52  ;;  %v1160_v10 = vld [vmem:[%s3597_s16 + $0x8] sm:$0xff] }
 0x61f   :  { %v3019_v11 = vpop.eup %3018  ;;  %v2843_v15 = vpack.c.bf16 %v2981_v12, %v2980_v13  ;;  %v2863_v12 = vpack.c.bf16 %v1160_v10, %v1159_v9  ;;  %v1161_v13 = vld [vmem:[%s3597_s16 + $0x10] sm:$0xff] }
 0x620   :  { %v743_v16 = vmul.f32 %v3019_v11, %v3011_v57  ;;  %v1162_v11 = vld [vmem:[%s3597_s16 + $0x18] sm:$0xff] }
 0x621   :  { %2645 = vmatmul.mubr.msk.f32.vlgmr.msra.gmra.mrb[4].mxu1 %vm111_vm0, %v540_v14  ;;  %2844 = vmatprep.subr.bf16.mxu1 %v2843_v15  ;;  %v2867_v14 = vpack.c.bf16 %v1162_v11, %v1161_v13 }
 0x622   :  { %2846 = vmatpush3.bf16.msra.mxu1 %v2843_v15  ;;  %2658 = vmatprep.mubr.msk.f32.mxu1 %vm111_vm0, %v743_v16  ;;  %v1163_v15 = vld [vmem:[%s3597_s16 + $0x20] sm:$0xff]  ;;  %v1164_v16 = vld [vmem:[%s3597_s16 + $0x28] sm:$0xff] }
 0x623   :  { %v3021_v17 = vpop.eup %3020  ;;  %2848 = vmatprep.subr.bf16.mxu1 %v2847_v22 }
 0x624   :  { %v744_v19 = vmul.f32 %v3021_v17, %v3013_v59  ;;  %v2871_v17 = vpack.c.bf16 %v1164_v16, %v1163_v15  ;;  %v2421_v15 = vld [vmem:[%s3600_s18] ss:$0 sm:$0xff] }
 0x626   :  { %2659 = vmatmul.mubr.msk.f32.vlgmr.msra.gmra.mrb[6].mxu1 %vm111_vm0, %v744_v19  ;;  %v1165_v19 = vld [vmem:[%s3597_s16 + $0x30] sm:$0xff] }
 0x627   :  { %2850 = vmatpush3.bf16.msra.mxu1 %v2847_v22  ;;  %v2875_v21 = vpack.c.bf16 %v1166_v20, %v1165_v19  ;;  %v2415_v22 = vld [vmem:[%s3598_s15] ss:$0 sm:$0xff] }
 0x628   :  { %2852 = vmatprep.subr.bf16.mxu1 %v2851_v26  ;;  %v2422_v20 = vld [vmem:[%s3601_s19] ss:$0 sm:$0xff] }
 0x6f4   :  { %v2646_v27 = vpop.f32.mrb[4].mxu1 }
 0x6f5   :  { %v619_v29 = vpop.f32.mrb[5].mxu1 }
 0x6f9   :  { %v2660_v30 = vpop.f32.mrb[6].mxu1 }
 0x6fa   :  { %v823_v31 = vpop.f32.mrb[7].mxu1 }
 0x6fb   :  { %2665 = vmatprep.mubr.msk.f32.mxu1 %vm111_vm0, %v823_v31 }
 0x6fc   :  { %2666 = vmatmul.mubr.msk.f32.vlgmr.msra.gmra.mrb[8].mxu1 %vm111_vm0, %v2660_v30 }
 0x6fd   :  { %2854 = vmatpush3.bf16.msra.mxu1 %v2851_v26  ;;  %2672 = vmatprep.mubr.msk.f32.mxu1 %vm111_vm0, %v619_v29 }
 0x6fe   :  { %2864 = vmatprep.subr.bf16.mxu1 %v2863_v12 }
 0x704   :  { %2673 = vmatmul.mubr.msk.f32.vlgmr.msra.gmra.mrb[8].mxu1 %vm111_vm0, %v2646_v27 }
 0x705   :  { %2866 = vmatpush3.bf16.msra.mxu1 %v2863_v12 }
 0x706   :  { %2868 = vmatprep.subr.bf16.mxu1 %v2867_v14 }
 0x709   :  { %2870 = vmatpush3.bf16.msra.mxu1 %v2867_v14 }
 0x70a   :  { %2872 = vmatprep.subr.bf16.mxu1 %v2871_v17 }
 0x70d   :  { %2874 = vmatpush3.bf16.msra.mxu1 %v2871_v17 }
 0x70e   :  { %2876 = vmatprep.subr.bf16.mxu1 %v2875_v21 }
 0x711   :  { %2878 = vmatpush3.bf16.msra.mxu1 %v2875_v21 }
 0x7d7   :  { %v2674_v33 = vpop.f32.mrb[8].mxu1 }
 0x7d8   :  { %v1002_v34 = vadd.f32 %v2674_v33, %v2412_v32  ;;  %v985_v35 = vpop.f32.mrb[9].mxu1 }
 0x7d9   :  { %v1001_v36 = vadd.f32 %v2412_v32, %v985_v35 }
 0x7da   :  { %v1004_v37 = vadd.f32 %v1002_v34, %v3259_v5 }
 0x7db   :  { %v1003_v38 = vadd.f32 %v1001_v36, %v3255_v3  ;;  %v1049_v3 = vld [vmem:[%s3594_s14] sm:$0xff] }
 0x7dc   :  { %v1010_v39 = vsel %vm284_vm6, %v1004_v37, 0.0  ;;  %v2855_v51 = vpack.c.bf16 %v1050_v50, %v1049_v3 }
 0x7dd   :  { %1011 = vadd.xlane.f32.xlu0 %v1010_v39  ;;  %v1007_v40 = vsel %vm284_vm6, %v1003_v38, 0.0 }
 0x7de   :  { %1008 = vadd.xlane.f32.xlu1 %v1007_v40  ;;  %2856 = vmatprep.subr.bf16.mxu0 %v2855_v51 }
 0x7df   :  { %2858 = vmatpush3.bf16.msra.mxu0 %v2855_v51 }
 0x7e0   :  { %2860 = vmatprep.subr.bf16.mxu0 %v2859_v54 }
 0x7e3   :  { %2862 = vmatpush3.bf16.msra.mxu0 %v2859_v54 }
 0x86a   :  { %v1012_v41 = vpop.xlane.xlu0 %1011 }
 0x86b   :  { %v1014_v42 = vmul.f32 0.03125, %v1012_v41  ;;  %v1009_v43 = vpop.xlane.xlu1 %1008 }
 0x86c   :  { %v1013_v44 = vmul.f32 0.03125, %v1009_v43 }
 0x86d   :  { %v1016_v45 = vsub.f32 %v1004_v37, %v1014_v42 }
 0x86e   :  { %v1015_v46 = vsub.f32 %v1003_v38, %v1013_v44 }
 0x86f   :  { %v1018_v47 = vmul.f32 %v1016_v45, %v1016_v45 }
 0x870   :  { %v1017_v48 = vmul.f32 %v1015_v46, %v1015_v46 }
 0x871   :  { %v1022_v49 = vsel %vm284_vm6, %v1018_v47, 0.0  ;;  %v2418_v47 = vld [vmem:[%s3599_s17] ss:$0 sm:$0xff] }
 0x872   :  { %1023 = vadd.xlane.f32.xlu0 %v1022_v49  ;;  %v1019_v5 = vsel %vm284_vm6, %v1017_v48, 0.0 }
 0x873   :  { %1020 = vadd.xlane.f32.xlu1 %v1019_v5 }
 0x8ff   :  { %v1024_v55 = vpop.xlane.xlu0 %1023 }
 0x900   :  { %v1026_v56 = vmul.f32 0.03125, %v1024_v55  ;;  %v1021_v57 = vpop.xlane.xlu1 %1020 }
 0x901   :  { %v1025_v58 = vmul.f32 0.03125, %v1021_v57 }
 0x902   :  { %v1028_v59 = vadd.f32 1e-12, %v1026_v56 }
 0x903   :  { %v1027_v60 = vadd.f32 1e-12, %v1025_v58 }
 0x904   :  { %3022 = vrsqrt.f32 %v1028_v59 }
 0x905   :  { %3024 = vrsqrt.f32 %v1027_v60 }
 0x90e   :  { %v3023_v61 = vpop.eup %3022 }
 0x90f   :  { %v3025_v63 = vpop.eup %3024  ;;  %v1032_v0 = vmul.f32 %v3023_v61, %v1016_v45 }
 0x910   :  { %v1031_v1 = vmul.f32 %v3025_v63, %v1015_v46 }
 0x911   :  { %v1040_v4 = vmul.f32 %v2413_v62, %v1032_v0  ;;  %v2423_v0 = vld [vmem:[%s3622_s0 + $0x20] sm:$0xff] }
 0x912   :  { %v1039_v6 = vmul.f32 %v2413_v62, %v1031_v1  ;;  %v2424_v1 = vld [vmem:[%s3622_s0 + $0x28] sm:$0xff] }
 0x913   :  { %v1048_v8 = vadd.f32 %v2414_v2, %v1040_v4  ;;  %v2425_v4 = vld [vmem:[%s3622_s0 + $0x30] sm:$0xff] }
 0x914   :  { %v1047_v7 = vadd.f32 %v2414_v2, %v1039_v6  ;;  %v2879_v2 = vpack.c.bf16 %v2424_v1, %v2423_v0  ;;  %v2426_v6 = vld [vmem:[%s3622_s0 + $0x38] sm:$0xff] }
 0x916   :  { %2683 = vmatprep.mubr.msk.f32.mxu0 %vm284_vm6, %v1047_v7  ;;  %2880 = vmatprep.subr.bf16.mxu0 %v2879_v2 }
 0x917   :  { %2684 = vmatmul.mubr.msk.f32.vlgmr.msra.gmra.mrb[4].mxu0 %vm284_vm6, %v1048_v8 }
 0x918   :  { %2882 = vmatpush3.bf16.msra.mxu0 %v2879_v2 }
 0x9ea   :  { %v2685_v23 = vpop.f32.mrb[4].mxu0 }
 0x9eb   :  { %v1138_v25 = vadd.f32 %v2685_v23, %v2415_v22  ;;  %v1132_v26 = vpop.f32.mrb[5].mxu0 }
 0x9ec   :  { %v1133_v27 = vadd.f32 %v2415_v22, %v1132_v26  ;;  %v2428_v26 = vld [vmem:[%s3590_s9 + $0x1] ss:$0 sm:$0xff] }
 0x9ed   :  { %v1144_v29 = vmul.f32 0.044715, %v1138_v25  ;;  %v1142_v44 = vmul.f32 0.5, %v1138_v25 }
 0x9ee   :  { %v1143_v30 = vmul.f32 0.044715, %v1133_v27  ;;  %v1141_v42 = vmul.f32 0.5, %v1133_v27 }
 0x9ef   :  { %v1146_v31 = vmul.f32 %v1144_v29, %v1138_v25 }
 0x9f0   :  { %v1145_v32 = vmul.f32 %v1143_v30, %v1133_v27 }
 0x9f1   :  { %v1148_v33 = vmul.f32 %v1146_v31, %v1138_v25 }
 0x9f2   :  { %v1147_v34 = vmul.f32 %v1145_v32, %v1133_v27 }
 0x9f3   :  { %v1150_v35 = vadd.f32 %v1148_v33, %v1138_v25 }
 0x9f4   :  { %v1149_v36 = vadd.f32 %v1147_v34, %v1133_v27 }
 0x9f5   :  { %v1152_v37 = vmul.f32 0.7978846, %v1150_v35 }
 0x9f6   :  { %v1151_v38 = vmul.f32 0.7978846, %v1149_v36 }
 0x9f7   :  { %3026 = vtanh.f32 %v1152_v37 }
 0x9f8   :  { %3028 = vtanh.f32 %v1151_v38 }
 0xa01   :  { %v3027_v39 = vpop.eup %3026 }
 0xa02   :  { %v3029_v40 = vpop.eup %3028  ;;  %v1156_v41 = vadd.f32 1.0, %v3027_v39 }
 0xa03   :  { %v1155_v43 = vadd.f32 1.0, %v3029_v40 }
 0xa04   :  { %v1158_v46 = vmul.f32 %v1156_v41, %v1142_v44 }
 0xa05   :  { %v1157_v45 = vmul.f32 %v1155_v43, %v1141_v42 }
 0xa07   :  { %2702 = vmatprep.mubr.msk.f32.mxu1 %vm194_vm4, %v1157_v45 }
 0xa08   :  { %2703 = vmatmul.mubr.msk.f32.vlgmr.msra.gmra.mrb[10].mxu1 %vm194_vm4, %v1158_v46 }
 0xadb   :  { %v2704_v48 = vpop.f32.mrb[10].mxu1 }
 0xadc   :  { %v1252_v49 = vadd.f32 %v2704_v48, %v2418_v47  ;;  %v1246_v5 = vpop.f32.mrb[11].mxu1 }
 0xadd   :  { %v1247_v3 = vadd.f32 %v2418_v47, %v1246_v5 }
 0xade   :  { %v1256_v50 = vadd.f32 %v1252_v49, %v1048_v8 }
 0xadf   :  { %v1255_v51 = vadd.f32 %v1247_v3, %v1047_v7  ;;  %v2883_v7 = vpack.c.bf16 %v2426_v6, %v2425_v4 }
 0xae0   :  { %v1262_v52 = vsel %vm284_vm6, %v1256_v50, 0.0 }
 0xae1   :  { %1263 = vadd.xlane.f32.xlu0 %v1262_v52  ;;  %v1259_v53 = vsel %vm284_vm6, %v1255_v51, 0.0  ;;  %2884 = vmatprep.subr.bf16.mxu0 %v2883_v7 }
 0xae2   :  { %1260 = vadd.xlane.f32.xlu1 %v1259_v53  ;;  %2886 = vmatpush3.bf16.msra.mxu0 %v2883_v7 }
 0xb6e   :  { %v1264_v54 = vpop.xlane.xlu0 %1263 }
 0xb6f   :  { %v1266_v55 = vmul.f32 0.03125, %v1264_v54  ;;  %v1261_v56 = vpop.xlane.xlu1 %1260 }
 0xb70   :  { %v1265_v57 = vmul.f32 0.03125, %v1261_v56 }
 0xb71   :  { %v1268_v58 = vsub.f32 %v1256_v50, %v1266_v55 }
 0xb72   :  { %v1267_v59 = vsub.f32 %v1255_v51, %v1265_v57 }
 0xb73   :  { %v1270_v60 = vmul.f32 %v1268_v58, %v1268_v58 }
 0xb74   :  { %v1269_v61 = vmul.f32 %v1267_v59, %v1267_v59 }
 0xb75   :  { %v1274_v62 = vsel %vm284_vm6, %v1270_v60, 0.0 }
 0xb76   :  { %1275 = vadd.xlane.f32.xlu0 %v1274_v62  ;;  %v1271_v63 = vsel %vm284_vm6, %v1269_v61, 0.0 }
 0xb77   :  { %1272 = vadd.xlane.f32.xlu1 %v1271_v63 }
 0xc03   :  { %v1276_v8 = vpop.xlane.xlu0 %1275 }
 0xc04   :  { %v1278_v9 = vmul.f32 0.03125, %v1276_v8  ;;  %v1273_v10 = vpop.xlane.xlu1 %1272 }
 0xc05   :  { %v1277_v12 = vmul.f32 0.03125, %v1273_v10 }
 0xc06   :  { %v1280_v13 = vadd.f32 1e-12, %v1278_v9 }
 0xc07   :  { %v1279_v11 = vadd.f32 1e-12, %v1277_v12 }
 0xc08   :  { %3030 = vrsqrt.f32 %v1280_v13 }
 0xc09   :  { %3032 = vrsqrt.f32 %v1279_v11 }
 0xc12   :  { %v3031_v14 = vpop.eup %3030 }
 0xc13   :  { %v3033_v16 = vpop.eup %3032  ;;  %v1284_v17 = vmul.f32 %v3031_v14, %v1268_v58 }
 0xc14   :  { %v1283_v19 = vmul.f32 %v3033_v16, %v1267_v59 }
 0xc15   :  { %v1292_v21 = vmul.f32 %v2421_v15, %v1284_v17 }
 0xc16   :  { %v1291_v22 = vmul.f32 %v2421_v15, %v1283_v19 }
 0xc17   :  { %v3423_v25 = vadd.f32 %v2422_v20, %v1292_v21 }
 0xc18   :  { %v3421_v23 = vadd.f32 %v2422_v20, %v1291_v22 }
 0xc1a   :  { %2713 = vmatprep.mubr.msk.f32.mxu0 %vm284_vm6, %v3421_v23 }
 0xc1b   :  { %2714 = vmatmul.mubr.msk.f32.vlgmr.msra.gmra.mrb[6].mxu0 %vm284_vm6, %v3423_v25 }
 0xcee   :  { %v2715_v27 = vpop.f32.mrb[6].mxu0 }
 0xcef   :  { %v1392_v29 = vadd.f32 %v2715_v27, %v2428_v26  ;;  %v1386_v30 = vpop.f32.mrb[7].mxu0 }
 0xcf0   :  { %v1387_v31 = vadd.f32 %v2428_v26, %v1386_v30 }
 0xcf2   :  { %2720 = vmatprep.mubr.msk.f32.mxu0 %vm111_vm0, %v1387_v31  ;;  %v3433_v32 = vpack.i.bf16 %v1392_v29, %v1387_v31 }
 0xcf4   :  { %2988 = vrot.lane.b32.xlu0 %v3433_v32, %s3064_s7  ;;  %2983 = vrot.lane.b32.xlu1 %v3433_v32, %s3065_s1 }
 0xcf8   :  { %1602 = vrot.lane.b32.xlu1 %v1387_v31, %s3066_s8 }
 0xcfc   :  { %1604 = vrot.lane.b32.xlu1 %v1392_v29, %s3066_s8 }
 0xd66   :  { %v2989_v33 = vpop.permute.xlu0 %2988  ;;  %v2984_v34 = vpop.permute.xlu1 %2983 }
 0xd67   :  { %v2991_v35 = vunpack.i.h.bf16 %v2989_v33  ;;  %v2990_v36 = vunpack.i.l.bf16 %v2989_v33  ;;  %v2986_v37 = vunpack.i.h.bf16 %v2984_v34  ;;  %v2985_v38 = vunpack.i.l.bf16 %v2984_v34 }
 0xd69   :  { %v2887_v39 = vpack.c.bf16 %v2986_v37, %v2985_v38  ;;  %v2897_v40 = vpack.c.bf16 %v2991_v35, %v2990_v36  ;;  %v2433_v37 = vld [vmem:[%s3592_s10 + $0x30] sm:$0xff]  ;;  %v2434_v38 = vld [vmem:[%s3592_s10 + $0x38] sm:$0xff] }
 0xd6a   :  { %v1603_v41 = vpop.permute.xlu1 %1602 }
 0xd6b   :  { %2889 = vmatprep.subr.msk.bf16.mxu0 %vm3277_vm7, %v2887_v39 }
 0xd6c   :  { %2892 = vmatpush3.bf16.xpose.msk.msra.mxu0 %vm3277_vm7, %v2887_v39  ;;  %v2907_v39 = vpack.c.bf16 %v2434_v38, %v2433_v37 }
 0xd6d   :  { %2899 = vmatprep.subr.msk.bf16.mxu0 %vm3277_vm7, %v2897_v40 }
 0xd6e   :  { %v1605_v42 = vpop.permute.xlu1 %1604 }
 0xd73   :  { %2721 = vmatmul.mubr.msk.f32.vlgmr.msra.gmra.mrb[8].mxu0 %vm111_vm0, %v1392_v29 }
 0xd74   :  { %2902 = vmatpush3.bf16.xpose.msk.msra.mxu0 %vm3277_vm7, %v2897_v40  ;;  %2734 = vmatprep.mubr.msk.f32.mxu0 %vm111_vm0, %v1603_v41  ;;  %v2431_v40 = vld [vmem:[%s3592_s10 + $0x20] sm:$0xff]  ;;  %v2432_v41 = vld [vmem:[%s3592_s10 + $0x28] sm:$0xff] }
 0xd7b   :  { %2735 = vmatmul.mubr.msk.f32.vlgmr.msra.gmra.mrb[10].mxu0 %vm111_vm0, %v1605_v42  ;;  %v2911_v42 = vpack.c.bf16 %v2432_v41, %v2431_v40 }
 0xe46   :  { %v2722_v43 = vpop.f32.mrb[8].mxu0 }
 0xe47   :  { %v1490_v44 = vmul.f32 0.25, %v2722_v43  ;;  %v1480_v45 = vpop.f32.mrb[9].mxu0 }
 0xe48   :  { %v1489_v46 = vmul.f32 0.25, %v1480_v45 }
 0xe49   :  { %v1492_v47 = vadd.f32 %v1490_v44, %v3295_v24 }
 0xe4a   :  { %v1491_v48 = vadd.f32 %v1489_v46, %v3300_v28 }
 0xe4b   :  { %v1496_v49 = vsel %vm111_vm0, %v1492_v47, -inf }
 0xe4c   :  { %1497 = vmax.xlane.f32.xlu1 %v1496_v49  ;;  %v1493_v5 = vsel %vm111_vm0, %v1491_v48, -inf }
 0xe4d   :  { %1494 = vmax.xlane.f32.xlu0 %v1493_v5 }
 0xe4e   :  { %v2736_v18 = vpop.f32.mrb[10].mxu0 }
 0xe4f   :  { %v1684_v3 = vpop.f32.mrb[11].mxu0  ;;  %v1694_v50 = vmul.f32 0.25, %v2736_v18 }
 0xe50   :  { %v1693_v51 = vmul.f32 0.25, %v1684_v3 }
 0xe51   :  { %v1696_v54 = vadd.f32 %v1694_v50, %v3295_v24 }
 0xe52   :  { %v1695_v52 = vadd.f32 %v1693_v51, %v3300_v28 }
 0xe53   :  { %v1700_v55 = vsel %vm111_vm0, %v1696_v54, -inf }
 0xe54   :  { %v1697_v53 = vsel %vm111_vm0, %v1695_v52, -inf }
 0xe55   :  { %1698 = vmax.xlane.f32.xlu0 %v1697_v53 }
 0xe59   :  { %1701 = vmax.xlane.f32.xlu0 %v1700_v55 }
 0xed9   :  { %v1498_v56 = vpop.xlane.xlu1 %1497 }
 0xeda   :  { %v1500_v57 = vsub.f32 %v1492_v47, %v1498_v56  ;;  %v1495_v58 = vpop.xlane.xlu0 %1494  ;;  %v2452_v47 = vld [vmem:[%s3593_s11 + $0x1] ss:$0 sm:$0xff] }
 0xedb   :  { %v1499_v59 = vsub.f32 %v1491_v48, %v1495_v58 }
 0xedc   :  { %v1503_v60 = vmul.f32 1.442695, %v1500_v57 }
 0xedd   :  { %v1501_v61 = vmul.f32 1.442695, %v1499_v59 }
 0xede   :  { %3034 = vpow2.f32 %v1503_v60 }
 0xedf   :  { %3036 = vpow2.f32 %v1501_v61 }
 0xee2   :  { %v1699_v62 = vpop.xlane.xlu0 %1698 }
 0xee3   :  { %v1703_v63 = vsub.f32 %v1695_v52, %v1699_v62  ;;  %v2458_v62 = vld [vmem:[%s3594_s14 + $0x28] sm:$0xff] }
 0xee5   :  { %v1705_v0 = vmul.f32 1.442695, %v1703_v63 }
 0xee6   :  { %v1702_v28 = vpop.xlane.xlu0 %1701 }
 0xee7   :  { %3038 = vpow2.f32 %v1705_v0  ;;  %v1704_v1 = vsub.f32 %v1696_v54, %v1702_v28  ;;  %v2459_v0 = vld [vmem:[%s3594_s14 + $0x30] sm:$0xff]  ;;  %v2460_v28 = vld [vmem:[%s3594_s14 + $0x38] sm:$0xff] }
 0xee8   :  { %v3035_v2 = vpop.eup %3034 }
 0xee9   :  { %v3037_v24 = vpop.eup %3036  ;;  %v1707_v4 = vmul.f32 1.442695, %v1704_v1  ;;  %v1508_v6 = vsel %vm111_vm0, %v3035_v2, 0.0  ;;  %v2919_v1 = vpack.c.bf16 %v2460_v28, %v2459_v0 }
 0xeea   :  { %1509 = vadd.xlane.f32.xlu0 %v1508_v6  ;;  %v1505_v7 = vsel %vm111_vm0, %v3037_v24, 0.0 }
 0xeeb   :  { %3040 = vpow2.f32 %v1707_v4  ;;  %1506 = vadd.xlane.f32.xlu1 %v1505_v7 }
 0xef1   :  { %v3039_v8 = vpop.eup %3038 }
 0xef2   :  { %v1709_v9 = vsel %vm111_vm0, %v3039_v8, 0.0 }
 0xef3   :  { %1710 = vadd.xlane.f32.xlu1 %v1709_v9 }
 0xef5   :  { %v3041_v10 = vpop.eup %3040 }
 0xef6   :  { %v1712_v12 = vsel %vm111_vm0, %v3041_v10, 0.0 }
 0xef7   :  { %1713 = vadd.xlane.f32.xlu0 %v1712_v12 }
 0xf04   :  { %2993 = vrot.lane.b32.xlu1 %v3433_v32, %s3067_s2 }
 0xf0d   :  { %2998 = vrot.lane.b32.xlu0 %v3433_v32, %s3068_s4 }
 0xf77   :  { %v1510_v11 = vpop.xlane.xlu0 %1509 }
 0xf78   :  { %v1507_v13 = vpop.xlane.xlu1 %1506 }
 0xf79   :  { %3042 = vrcp.f32 %v1507_v13 }
 0xf7a   :  { %3044 = vrcp.f32 %v1510_v11 }
 0xf80   :  { %v1711_v14 = vpop.xlane.xlu1 %1710 }
 0xf81   :  { %3046 = vrcp.f32 %v1711_v14  ;;  %v2456_v14 = vld [vmem:[%s3596_s13 + $0x1] ss:$0 sm:$0xff] }
 0xf83   :  { %v3043_v15 = vpop.eup %3042 }
 0xf84   :  { %v2994_v16 = vpop.permute.xlu1 %2993  ;;  %v1714_v17 = vpop.xlane.xlu0 %1713  ;;  %v1513_v19 = vmul.f32 %v3043_v15, %v3037_v24 }
 0xf85   :  { %v2996_v20 = vunpack.i.h.bf16 %v2994_v16  ;;  %v2995_v21 = vunpack.i.l.bf16 %v2994_v16  ;;  %3048 = vrcp.f32 %v1714_v17  ;;  %v3045_v26 = vpop.eup %3044 }
 0xf86   :  { %2727 = vmatprep.mubr.msk.f32.mxu1 %vm111_vm0, %v1513_v19  ;;  %v1514_v32 = vmul.f32 %v3045_v26, %v3035_v2  ;;  %v2467_v26 = vld [vmem:[%s3597_s16 + $0x50] sm:$0xff] }
 0xf87   :  { %v2893_v22 = vpack.c.bf16 %v2996_v20, %v2995_v21  ;;  %v2465_v20 = vld [vmem:[%s3597_s16 + $0x40] sm:$0xff]  ;;  %v2466_v21 = vld [vmem:[%s3597_s16 + $0x48] sm:$0xff] }
 0xf88   :  { %v2999_v27 = vpop.permute.xlu0 %2998 }
 0xf89   :  { %v3001_v29 = vunpack.i.h.bf16 %v2999_v27  ;;  %v3000_v30 = vunpack.i.l.bf16 %v2999_v27  ;;  %2894 = vmatprep.subr.bf16.mxu1 %v2893_v22  ;;  %v2468_v27 = vld [vmem:[%s3597_s16 + $0x58] sm:$0xff] }
 0xf8a   :  { %2896 = vmatpush3.bf16.msra.mxu1 %v2893_v22  ;;  %v2923_v22 = vpack.c.bf16 %v2466_v21, %v2465_v20 }
 0xf8b   :  { %v3047_v31 = vpop.eup %3046  ;;  %v2903_v33 = vpack.c.bf16 %v3001_v29, %v3000_v30  ;;  %v2927_v29 = vpack.c.bf16 %v2468_v27, %v2467_v26  ;;  %v2469_v30 = vld [vmem:[%s3597_s16 + $0x60] sm:$0xff] }
 0xf8c   :  { %v1717_v34 = vmul.f32 %v3047_v31, %v3039_v8  ;;  %v2470_v31 = vld [vmem:[%s3597_s16 + $0x68] sm:$0xff]  ;;  %v2479_v26 = vld [vmem:[%s3600_s18 + $0x1] ss:$0 sm:$0xff] }
 0xf8d   :  { %2728 = vmatmul.mubr.msk.f32.vlgmr.msra.gmra.mrb[12].mxu1 %vm111_vm0, %v1514_v32  ;;  %2904 = vmatprep.subr.bf16.mxu1 %v2903_v33  ;;  %v2931_v32 = vpack.c.bf16 %v2470_v31, %v2469_v30  ;;  %v2480_v31 = vld [vmem:[%s3601_s19 + $0x1] ss:$0 sm:$0xff] }
 0xf8e   :  { %2906 = vmatpush3.bf16.msra.mxu1 %v2903_v33  ;;  %2741 = vmatprep.mubr.msk.f32.mxu1 %vm111_vm0, %v1717_v34  ;;  %v2471_v33 = vld [vmem:[%s3597_s16 + $0x70] sm:$0xff]  ;;  %v2472_v34 = vld [vmem:[%s3597_s16 + $0x78] sm:$0xff] }
 0xf8f   :  { %v3049_v35 = vpop.eup %3048  ;;  %2908 = vmatprep.subr.bf16.mxu1 %v2907_v39 }
 0xf90   :  { %v1718_v36 = vmul.f32 %v3049_v35, %v3041_v10  ;;  %v2455_v10 = vld [vmem:[%s3595_s12 + $0x1] ss:$0 sm:$0xff]  ;;  %v2935_v35 = vpack.c.bf16 %v2472_v34, %v2471_v33 }
 0xf92   :  { %2742 = vmatmul.mubr.msk.f32.vlgmr.msra.gmra.mrb[14].mxu1 %vm111_vm0, %v1718_v36  ;;  %v2462_v36 = vld [vmem:[%s3598_s15 + $0x1] ss:$0 sm:$0xff] }
 0xf93   :  { %2910 = vmatpush3.bf16.msra.mxu1 %v2907_v39 }
 0xf94   :  { %2912 = vmatprep.subr.bf16.mxu1 %v2911_v42 }
0x1060   :  { %v2729_v43 = vpop.f32.mrb[12].mxu1 }
0x1061   :  { %v1593_v44 = vpop.f32.mrb[13].mxu1 }
0x1065   :  { %v2743_v45 = vpop.f32.mrb[14].mxu1 }
0x1066   :  { %v1797_v46 = vpop.f32.mrb[15].mxu1 }
0x1067   :  { %2748 = vmatprep.mubr.msk.f32.mxu1 %vm111_vm0, %v1797_v46 }
0x1068   :  { %2749 = vmatmul.mubr.msk.f32.vlgmr.msra.gmra.mrb[16].mxu1 %vm111_vm0, %v2743_v45 }
0x1069   :  { %2914 = vmatpush3.bf16.msra.mxu1 %v2911_v42  ;;  %2755 = vmatprep.mubr.msk.f32.mxu1 %vm111_vm0, %v1593_v44 }
0x106a   :  { %2924 = vmatprep.subr.bf16.mxu1 %v2923_v22 }
0x1070   :  { %2756 = vmatmul.mubr.msk.f32.vlgmr.msra.gmra.mrb[16].mxu1 %vm111_vm0, %v2729_v43 }
0x1071   :  { %2926 = vmatpush3.bf16.msra.mxu1 %v2923_v22 }
0x1072   :  { %2928 = vmatprep.subr.bf16.mxu1 %v2927_v29 }
0x1075   :  { %2930 = vmatpush3.bf16.msra.mxu1 %v2927_v29 }
0x1076   :  { %2932 = vmatprep.subr.bf16.mxu1 %v2931_v32 }
0x1079   :  { %2934 = vmatpush3.bf16.msra.mxu1 %v2931_v32 }
0x107a   :  { %2936 = vmatprep.subr.bf16.mxu1 %v2935_v35 }
0x107d   :  { %2938 = vmatpush3.bf16.msra.mxu1 %v2935_v35 }
0x1143   :  { %v2757_v48 = vpop.f32.mrb[16].mxu1 }
0x1144   :  { %v1977_v49 = vadd.f32 %v2757_v48, %v2452_v47  ;;  %v1959_v5 = vpop.f32.mrb[17].mxu1 }
0x1145   :  { %v1976_v18 = vadd.f32 %v2452_v47, %v1959_v5 }
0x1146   :  { %v1979_v3 = vadd.f32 %v1977_v49, %v3423_v25 }
0x1147   :  { %v1978_v50 = vadd.f32 %v1976_v18, %v3421_v23  ;;  %v2457_v23 = vld [vmem:[%s3594_s14 + $0x20] sm:$0xff] }
0x1148   :  { %v1987_v51 = vsel %vm284_vm6, %v1979_v3, 0.0  ;;  %v2915_v63 = vpack.c.bf16 %v2458_v62, %v2457_v23 }
0x1149   :  { %1988 = vadd.xlane.f32.xlu0 %v1987_v51  ;;  %v1984_v52 = vsel %vm284_vm6, %v1978_v50, 0.0 }
0x114a   :  { %1985 = vadd.xlane.f32.xlu1 %v1984_v52  ;;  %2916 = vmatprep.subr.bf16.mxu0 %v2915_v63 }
0x114b   :  { %2918 = vmatpush3.bf16.msra.mxu0 %v2915_v63 }
0x114c   :  { %2920 = vmatprep.subr.bf16.mxu0 %v2919_v1 }
0x114f   :  { %2922 = vmatpush3.bf16.msra.mxu0 %v2919_v1 }
0x11d6   :  { %v1989_v53 = vpop.xlane.xlu0 %1988 }
0x11d7   :  { %v1991_v54 = vmul.f32 0.03125, %v1989_v53  ;;  %v1986_v55 = vpop.xlane.xlu1 %1985 }
0x11d8   :  { %v1990_v56 = vmul.f32 0.03125, %v1986_v55 }
0x11d9   :  { %v1993_v57 = vsub.f32 %v1979_v3, %v1991_v54 }
0x11da   :  { %v1992_v58 = vsub.f32 %v1978_v50, %v1990_v56  ;;  %v2474_v56 = vld [vmem:[%s3599_s17 + $0x1] ss:$0 sm:$0xff] }
0x11db   :  { %v1995_v59 = vmul.f32 %v1993_v57, %v1993_v57 }
0x11dc   :  { %v1994_v60 = vmul.f32 %v1992_v58, %v1992_v58 }
0x11dd   :  { %v1999_v61 = vsel %vm284_vm6, %v1995_v59, 0.0 }
0x11de   :  { %2000 = vadd.xlane.f32.xlu0 %v1999_v61  ;;  %v1996_v25 = vsel %vm284_vm6, %v1994_v60, 0.0 }
0x11df   :  { %1997 = vadd.xlane.f32.xlu1 %v1996_v25 }
0x126b   :  { %v2001_v2 = vpop.xlane.xlu0 %2000 }
0x126c   :  { %v2003_v24 = vmul.f32 0.03125, %v2001_v2  ;;  %v1998_v4 = vpop.xlane.xlu1 %1997 }
0x126d   :  { %v2002_v6 = vmul.f32 0.03125, %v1998_v4 }
0x126e   :  { %v2005_v7 = vadd.f32 1e-12, %v2003_v24 }
0x126f   :  { %v2004_v8 = vadd.f32 1e-12, %v2002_v6 }
0x1270   :  { %3050 = vrsqrt.f32 %v2005_v7 }
0x1271   :  { %3052 = vrsqrt.f32 %v2004_v8 }
0x127a   :  { %v3051_v9 = vpop.eup %3050 }
0x127b   :  { %v3053_v12 = vpop.eup %3052  ;;  %v2009_v13 = vmul.f32 %v3051_v9, %v1993_v57  ;;  %v2284_v9 = vld [vmem:[%s3602_s20] sm:$0xff] }
0x127c   :  { %v2008_v11 = vmul.f32 %v3053_v12, %v1992_v58 }
0x127d   :  { %v2017_v15 = vmul.f32 %v2455_v10, %v2009_v13  ;;  %v2286_v13 = vld [vmem:[%s3602_s20 + $0x10] sm:$0xff] }
0x127e   :  { %v2016_v16 = vmul.f32 %v2455_v10, %v2008_v11  ;;  %v2285_v10 = vld [vmem:[%s3602_s20 + $0x8] sm:$0xff]  ;;  %v2287_v11 = vld [vmem:[%s3602_s20 + $0x18] sm:$0xff] }
0x127f   :  { %v2025_v19 = vadd.f32 %v2456_v14, %v2017_v15  ;;  %v2939_v12 = vpack.c.bf16 %v2285_v10, %v2284_v9 }
0x1280   :  { %v2024_v17 = vadd.f32 %v2456_v14, %v2016_v16  ;;  %v2943_v14 = vpack.c.bf16 %v2287_v11, %v2286_v13 }
0x1281   :  { %2940 = vmatprep.subr.bf16.mxu0 %v2939_v12 }
0x1282   :  { %2766 = vmatprep.mubr.msk.f32.mxu0 %vm284_vm6, %v2024_v17 }
0x1283   :  { %2767 = vmatmul.mubr.msk.f32.vlgmr.msra.gmra.mrb[12].mxu0 %vm284_vm6, %v2025_v19 }
0x1284   :  { %2942 = vmatpush3.bf16.msra.mxu0 %v2939_v12 }
0x1285   :  { %2944 = vmatprep.subr.bf16.mxu0 %v2943_v14 }
0x1288   :  { %2946 = vmatpush3.bf16.msra.mxu0 %v2943_v14 }
0x1356   :  { %v2768_v37 = vpop.f32.mrb[12].mxu0 }
0x1357   :  { %v2117_v38 = vadd.f32 %v2768_v37, %v2462_v36  ;;  %v2111_v39 = vpop.f32.mrb[13].mxu0 }
0x1358   :  { %v2112_v40 = vadd.f32 %v2462_v36, %v2111_v39  ;;  %v2481_v36 = vld [vmem:[%s3603_s21] ss:$0 sm:$0xff] }
0x1359   :  { %v2123_v41 = vmul.f32 0.044715, %v2117_v38  ;;  %v2121_v53 = vmul.f32 0.5, %v2117_v38 }
0x135a   :  { %v2122_v42 = vmul.f32 0.044715, %v2112_v40  ;;  %v2120_v51 = vmul.f32 0.5, %v2112_v40 }
0x135b   :  { %v2125_v43 = vmul.f32 %v2123_v41, %v2117_v38 }
0x135c   :  { %v2124_v44 = vmul.f32 %v2122_v42, %v2112_v40 }
0x135d   :  { %v2127_v45 = vmul.f32 %v2125_v43, %v2117_v38 }
0x135e   :  { %v2126_v46 = vmul.f32 %v2124_v44, %v2112_v40 }
0x135f   :  { %v2129_v47 = vadd.f32 %v2127_v45, %v2117_v38 }
0x1360   :  { %v2128_v48 = vadd.f32 %v2126_v46, %v2112_v40 }
0x1361   :  { %v2131_v49 = vmul.f32 0.7978846, %v2129_v47 }
0x1362   :  { %v2130_v5 = vmul.f32 0.7978846, %v2128_v48 }
0x1363   :  { %3054 = vtanh.f32 %v2131_v49 }
0x1364   :  { %3056 = vtanh.f32 %v2130_v5 }
0x136d   :  { %v3055_v18 = vpop.eup %3054 }
0x136e   :  { %v3057_v3 = vpop.eup %3056  ;;  %v2135_v50 = vadd.f32 1.0, %v3055_v18 }
0x136f   :  { %v2134_v52 = vadd.f32 1.0, %v3057_v3 }
0x1370   :  { %v2137_v55 = vmul.f32 %v2135_v50, %v2121_v53 }
0x1371   :  { %v2136_v54 = vmul.f32 %v2134_v52, %v2120_v51 }
0x1373   :  { %2785 = vmatprep.mubr.msk.f32.mxu1 %vm194_vm4, %v2136_v54 }
0x1374   :  { %2786 = vmatmul.mubr.msk.f32.vlgmr.msra.gmra.mrb[18].mxu1 %vm194_vm4, %v2137_v55 }
0x1447   :  { %v2787_v57 = vpop.f32.mrb[18].mxu1 }
0x1448   :  { %v2233_v58 = vadd.f32 %v2787_v57, %v2474_v56  ;;  %v2227_v59 = vpop.f32.mrb[19].mxu1 }
0x1449   :  { %v2228_v60 = vadd.f32 %v2474_v56, %v2227_v59 }
0x144a   :  { %v2237_v61 = vadd.f32 %v2233_v58, %v2025_v19 }
0x144b   :  { %v2236_v25 = vadd.f32 %v2228_v60, %v2024_v17 }
0x144c   :  { %v2245_v23 = vsel %vm284_vm6, %v2237_v61, 0.0 }
0x144d   :  { %2246 = vadd.xlane.f32.xlu0 %v2245_v23  ;;  %v2242_v62 = vsel %vm284_vm6, %v2236_v25, 0.0 }
0x144e   :  { %2243 = vadd.xlane.f32.xlu1 %v2242_v62 }
0x14da   :  { %v2247_v63 = vpop.xlane.xlu0 %2246 }
0x14db   :  { %v2249_v0 = vmul.f32 0.03125, %v2247_v63  ;;  %v2244_v28 = vpop.xlane.xlu1 %2243 }
0x14dc   :  { %v2248_v1 = vmul.f32 0.03125, %v2244_v28 }
0x14dd   :  { %v2251_v2 = vsub.f32 %v2237_v61, %v2249_v0 }
0x14de   :  { %v2250_v24 = vsub.f32 %v2236_v25, %v2248_v1 }
0x14df   :  { %v2253_v4 = vmul.f32 %v2251_v2, %v2251_v2 }
0x14e0   :  { %v2252_v6 = vmul.f32 %v2250_v24, %v2250_v24 }
0x14e1   :  { %v2257_v7 = vsel %vm284_vm6, %v2253_v4, 0.0 }
0x14e2   :  { %2258 = vadd.xlane.f32.xlu0 %v2257_v7  ;;  %v2254_v8 = vsel %vm284_vm6, %v2252_v6, 0.0 }
0x14e3   :  { %2255 = vadd.xlane.f32.xlu1 %v2254_v8 }
0x156f   :  { %v2259_v15 = vpop.xlane.xlu0 %2258 }
0x1570   :  { %v2261_v16 = vmul.f32 0.03125, %v2259_v15  ;;  %v2256_v17 = vpop.xlane.xlu1 %2255 }
0x1571   :  { %v2260_v19 = vmul.f32 0.03125, %v2256_v17 }
0x1572   :  { %v2263_v20 = vadd.f32 1e-12, %v2261_v16 }
0x1573   :  { %v2262_v21 = vadd.f32 1e-12, %v2260_v19 }
0x1574   :  { %3058 = vrsqrt.f32 %v2263_v20 }
0x1575   :  { %3060 = vrsqrt.f32 %v2262_v21 }
0x157e   :  { %v3059_v22 = vpop.eup %3058 }
0x157f   :  { %v3061_v27 = vpop.eup %3060  ;;  %v2267_v29 = vmul.f32 %v3059_v22, %v2251_v2 }
0x1580   :  { %v2266_v30 = vmul.f32 %v3061_v27, %v2250_v24 }
0x1581   :  { %v2275_v32 = vmul.f32 %v2479_v26, %v2267_v29 }
0x1582   :  { %v2274_v33 = vmul.f32 %v2479_v26, %v2266_v30 }
0x1583   :  { %v2283_v35 = vadd.f32 %v2480_v31, %v2275_v32 }
0x1584   :  { %v2282_v34 = vadd.f32 %v2480_v31, %v2274_v33 }
0x1586   :  { %2796 = vmatprep.mubr.msk.f32.mxu0 %vm284_vm6, %v2282_v34 }
0x1587   :  { %2797 = vmatmul.mubr.msk.f32.vlgmr.msra.gmra.mrb[14].mxu0 %vm284_vm6, %v2283_v35 }
0x165a   :  { %v2798_v37 = vpop.f32.mrb[14].mxu0 }
0x165b   :  { %v2373_v38 = vadd.f32 %v2798_v37, %v2481_v36  ;;  %v2367_v39 = vpop.f32.mrb[15].mxu0 }
0x165c   :  { %v2368_v40 = vadd.f32 %v2481_v36, %v2367_v39 }
0x165d   :  { %2377 = vst [vmem:[%s3604_s22 + $0x8] sm:$0xff] %v2373_v38 }
0x165e   :  { %2376 = vst [vmem:[%s3604_s22] sm:$0xff] %v2368_v40 }

</bundles_post_ra>
